<compile_context>
chip_gen: v6e
topology: v6e:2x2x1
jax: 0.10.0
libtpu: 0.0.40
codegen_flags: <defaults>
</compile_context>

<pallas_src>
import functools

import jax
import jax.numpy as jnp
from jax.experimental import pallas as pl
from jax.experimental.pallas import tpu as pltpu


def _mha_kernel(x_ref, mask_ref, wq_ref, wk_ref, wv_ref, wp_ref, bp_ref, o_ref,
                *, num_heads, head_size):
    # x_ref:    (B_blk, T, E)    block of batch elements
    # mask_ref: (T, T) float32   additive mask (0 = keep, -1e30 = masked)
    # wq/wk/wv: (E, H*hs)        concatenated head weights (scale folded in Wq)
    # wp_ref:   (H, hs, E)       output projection weight, per head
    # bp_ref:   (1, E)           output projection bias (f32)
    # o_ref:    (B_blk, T, E)
    Bb, T, E = x_ref.shape
    H, hs = num_heads, head_size
    M = Bb * T
    cdt = wq_ref.dtype                       # matmul compute dtype (f32 or bf16)

    x = x_ref[...].astype(cdt).reshape(M, E)             # merge batch into M

    # One big matmul per projection for the whole batch block.
    q = jnp.dot(x, wq_ref[...], preferred_element_type=jnp.float32)   # (M, H*hs)
    k = jnp.dot(x, wk_ref[...], preferred_element_type=jnp.float32)
    v = jnp.dot(x, wv_ref[...], preferred_element_type=jnp.float32)

    # Hoisted additive mask, broadcast once (not per head).
    mask_add = jnp.broadcast_to(mask_ref[...], (Bb, T, T))

    acc = jnp.zeros((M, E), jnp.float32)                 # output-proj accumulator
    for h in range(H):                                   # static, unrolled (H small)
        lo, hi = h * hs, (h + 1) * hs
        qh = q[:, lo:hi].reshape(Bb, T, hs)
        kh = k[:, lo:hi].reshape(Bb, T, hs)
        vh = v[:, lo:hi].reshape(Bb, T, hs)

        # Scores for all batch elements of this block at once (batched matmul).
        s = jnp.einsum("bqd,bkd->bqk", qh, kh,
                       preferred_element_type=jnp.float32)            # (Bb, T, T)
        s = s + mask_add
        m = jnp.max(s, axis=-1, keepdims=True)
        e = jnp.exp(s - m)
        p = e * pl.reciprocal(jnp.sum(e, axis=-1, keepdims=True), approx=True)
        # dropout(p=0.0) is identity

        oh = jnp.einsum("bqk,bkd->bqd", p, vh,
                        preferred_element_type=jnp.float32)           # (Bb, T, hs)
        # Accumulate this head's contribution to the output projection
        # (replaces concat + one big final slice-heavy matmul).
        acc = acc + jnp.dot(oh.reshape(M, hs).astype(cdt), wp_ref[h],
                            preferred_element_type=jnp.float32)

    out = acc + bp_ref[...]                               # (M, E) + (1, E)
    o_ref[...] = out.reshape(Bb, T, E).astype(o_ref.dtype)


def multi_head_attention(x, mask, wq, wk, wv, wp, bp, *, num_heads, head_size,
                         batch_block=None, compute_dtype=None):
    """x: (B, T, E); mask: (T, T) (0 => masked) or None; returns (B, T, E).

    compute_dtype: optional dtype (e.g. jnp.bfloat16) for matmul inputs on
    v6e/v7x; softmax / accumulation stay in float32.
    """
    B, T, E = x.shape
    H, hs = num_heads, head_size
    Hhs = H * hs
    assert wq.shape == (E, Hhs) and wk.shape == (E, Hhs) and wv.shape == (E, Hhs)
    assert wp.shape == (Hhs, E) and bp.shape == (1, E)

    if batch_block is None:
        # Keep >=2 grid steps when possible (v7x has 2 TensorCores).
        batch_block = B // 2 if (B >= 2 and B % 2 == 0) else B
    assert B % batch_block == 0, "batch must be divisible by batch_block"
    grid_b = B // batch_block

    out_dtype = x.dtype
    cdt = compute_dtype if compute_dtype is not None else x.dtype

    # Fold the attention scale into Wq (free, done outside the kernel).
    scale = float(head_size) ** -0.5
    wq_s = (wq.astype(jnp.float32) * scale).astype(cdt)
    wk_c = wk.astype(cdt)
    wv_c = wv.astype(cdt)
    wp_h = wp.astype(cdt).reshape(H, hs, E)     # per-head output projection
    bp_f = bp.astype(jnp.float32)
    x_c = x.astype(cdt)

    # Additive float mask: 0 where attended, -1e30 where masked (avoids the
    # -inf NaN hazard of masked_fill for fully-masked rows).
    if mask is None:
        mask_add = jnp.zeros((T, T), jnp.float32)
    else:
        mask_add = jnp.where(mask == 0, jnp.float32(-1e30), jnp.float32(0.0))

    kernel = functools.partial(_mha_kernel, num_heads=H, head_size=hs)
    return pl.pallas_call(
        kernel,
        out_shape=jax.ShapeDtypeStruct((B, T, E), out_dtype),
        grid_spec=pltpu.PrefetchScalarGridSpec(
            num_scalar_prefetch=0,
            grid=(grid_b,),
            in_specs=[
                pl.BlockSpec((batch_block, T, E), lambda b: (b, 0, 0)),  # x block
                pl.BlockSpec((T, T), lambda b: (0, 0)),                  # additive mask
                pl.BlockSpec((E, Hhs), lambda b: (0, 0)),                # Wq (scaled)
                pl.BlockSpec((E, Hhs), lambda b: (0, 0)),                # Wk
                pl.BlockSpec((E, Hhs), lambda b: (0, 0)),                # Wv
                pl.BlockSpec((H, hs, E), lambda b: (0, 0, 0)),           # Wproj per head
                pl.BlockSpec((1, E), lambda b: (0, 0)),                  # bproj
            ],
            out_specs=pl.BlockSpec((batch_block, T, E), lambda b: (b, 0, 0)),
        ),
        compiler_params=pltpu.CompilerParams(
            dimension_semantics=("parallel",)),
    )(x_c, mask_add, wq_s, wk_c, wv_c, wp_h, bp_f)


def reference_mha(x, mask, wq, wk, wv, wp, bp, *, num_heads, head_size):
    """Pure-JAX reference mirroring the PyTorch forward."""
    q = x @ wq
    k = x @ wk
    v = x @ wv
    outs = []
    for h in range(num_heads):
        lo, hi = h * head_size, (h + 1) * head_size
        wei = q[..., lo:hi] @ jnp.swapaxes(k[..., lo:hi], -2, -1) * head_size ** -0.5
        wei = jnp.where(mask == 0, -jnp.inf, wei)
        wei = jax.nn.softmax(wei, axis=-1)
        outs.append(wei @ v[..., lo:hi])
    cat = jnp.concatenate(outs, axis=-1)
    return cat @ wp + bp


if __name__ == "__main__":
    # Small shapes consistent with the module: num_heads=4, head_size=8, n_embd=32.
    # Batch of 8 so batch coarsening is meaningful (grid = 8/4 = 2 steps).
    B, T, E = 8, 8, 32
    num_heads, head_size = 4, 8
    Hhs = num_heads * head_size

    key = jax.random.PRNGKey(0)
    kx, kq, kk, kv, kp, kb = jax.random.split(key, 6)

    x = jax.random.normal(kx, (B, T, E), dtype=jnp.float32)

    # Synthetic parameters (per-head Linear(E, hs, bias=False) weights
    # concatenated across heads, stored pre-transposed for right-mult).
    wq = jax.random.normal(kq, (E, Hhs), dtype=jnp.float32) * 0.1
    wk = jax.random.normal(kk, (E, Hhs), dtype=jnp.float32) * 0.1
    wv = jax.random.normal(kv, (E, Hhs), dtype=jnp.float32) * 0.1
    wp = jax.random.normal(kp, (Hhs, E), dtype=jnp.float32) * 0.1   # proj weight^T
    bp = jax.random.normal(kb, (1, E), dtype=jnp.float32) * 0.1     # proj bias

    # Causal mask (0 => masked), shared across batch and heads.
    mask = jnp.tril(jnp.ones((T, T), dtype=jnp.int32))

    ref = reference_mha(x, mask, wq, wk, wv, wp, bp,
                        num_heads=num_heads, head_size=head_size)

    # f32 path (all chips).
    out = multi_head_attention(x, mask, wq, wk, wv, wp, bp,
                               num_heads=num_heads, head_size=head_size,
                               batch_block=4)
    out = jax.block_until_ready(out)
    assert out.shape == (B, T, E)
    assert jnp.allclose(out, ref, atol=1e-2, rtol=1e-2), "f32 kernel mismatch vs reference"

    # bf16 matmul-input path (recommended on v6e/v7x); softmax stays in f32.
    out_bf16 = multi_head_attention(x, mask, wq, wk, wv, wp, bp,
                                    num_heads=num_heads, head_size=head_size,
                                    batch_block=4, compute_dtype=jnp.bfloat16)
    out_bf16 = jax.block_until_ready(out_bf16)
    assert jnp.allclose(out_bf16, ref, atol=5e-2, rtol=5e-2), "bf16 kernel mismatch vs reference"

    print("KERNEL_OK")
</pallas_src>

<mosaic_0001>
module attributes {stable_mosaic.version = 11 : i64} {
  func.func @_mha_kernel(%arg0: i32, %arg1: memref<4x8x32xf32, #tpu.memory_space<vmem>>, %arg2: memref<8x8xf32, #tpu.memory_space<vmem>>, %arg3: memref<32x32xf32, #tpu.memory_space<vmem>>, %arg4: memref<32x32xf32, #tpu.memory_space<vmem>>, %arg5: memref<32x32xf32, #tpu.memory_space<vmem>>, %arg6: memref<4x8x32xf32, #tpu.memory_space<vmem>>, %arg7: memref<1x32xf32, #tpu.memory_space<vmem>>, %arg8: memref<4x8x32xf32, #tpu.memory_space<vmem>>) attributes {dimension_semantics = [#tpu.dimension_semantics<parallel>], iteration_bounds = array<i64: 2>, scalar_prefetch = 0 : i64, scratch_operands = 0 : i64, tpu.core_type = #tpu.core_type<tc>, window_params = [{transform_indices = @transform_0, window_bounds = array<i64: 4, 8, 32>}, {pipeline_mode = #tpu.pipeline_mode<synchronous>, transform_indices = @transform_1, window_bounds = array<i64: 8, 8>}, {pipeline_mode = #tpu.pipeline_mode<synchronous>, transform_indices = @transform_2, window_bounds = array<i64: 32, 32>}, {pipeline_mode = #tpu.pipeline_mode<synchronous>, transform_indices = @transform_3, window_bounds = array<i64: 32, 32>}, {pipeline_mode = #tpu.pipeline_mode<synchronous>, transform_indices = @transform_4, window_bounds = array<i64: 32, 32>}, {pipeline_mode = #tpu.pipeline_mode<synchronous>, transform_indices = @transform_5, window_bounds = array<i64: 4, 8, 32>}, {pipeline_mode = #tpu.pipeline_mode<synchronous>, transform_indices = @transform_6, window_bounds = array<i64: 1, 32>}, {transform_indices = @transform_7, window_bounds = array<i64: 4, 8, 32>}]} {
    %c0 = arith.constant 0 : index
    %c0_0 = arith.constant 0 : index
    %c0_1 = arith.constant 0 : index
    %0 = vector.load %arg1[%c0, %c0_0, %c0_1] : memref<4x8x32xf32, #tpu.memory_space<vmem>>, vector<4x8x32xf32>
    %1 = vector.shape_cast %0 : vector<4x8x32xf32> to vector<32x32xf32>
    %c0_2 = arith.constant 0 : index
    %c0_3 = arith.constant 0 : index
    %2 = vector.load %arg3[%c0_2, %c0_3] : memref<32x32xf32, #tpu.memory_space<vmem>>, vector<32x32xf32>
    %cst = arith.constant dense<0.000000e+00> : vector<32x32xf32>
    %3 = tpu.matmul %1, %2, %cst {dimension_numbers = #tpu.dot_dimension_numbers<[1], [0], [0], [1], [0, 0, 1, 1], [], []>} : vector<32x32xf32>, vector<32x32xf32>, vector<32x32xf32> -> vector<32x32xf32>
    %c0_4 = arith.constant 0 : index
    %c0_5 = arith.constant 0 : index
    %4 = vector.load %arg4[%c0_4, %c0_5] : memref<32x32xf32, #tpu.memory_space<vmem>>, vector<32x32xf32>
    %cst_6 = arith.constant dense<0.000000e+00> : vector<32x32xf32>
    %5 = tpu.matmul %1, %4, %cst_6 {dimension_numbers = #tpu.dot_dimension_numbers<[1], [0], [0], [1], [0, 0, 1, 1], [], []>} : vector<32x32xf32>, vector<32x32xf32>, vector<32x32xf32> -> vector<32x32xf32>
    %c0_7 = arith.constant 0 : index
    %c0_8 = arith.constant 0 : index
    %6 = vector.load %arg5[%c0_7, %c0_8] : memref<32x32xf32, #tpu.memory_space<vmem>>, vector<32x32xf32>
    %cst_9 = arith.constant dense<0.000000e+00> : vector<32x32xf32>
    %7 = tpu.matmul %1, %6, %cst_9 {dimension_numbers = #tpu.dot_dimension_numbers<[1], [0], [0], [1], [0, 0, 1, 1], [], []>} : vector<32x32xf32>, vector<32x32xf32>, vector<32x32xf32> -> vector<32x32xf32>
    %c0_10 = arith.constant 0 : index
    %c0_11 = arith.constant 0 : index
    %8 = vector.load %arg2[%c0_10, %c0_11] : memref<8x8xf32, #tpu.memory_space<vmem>>, vector<8x8xf32>
    %9 = vector.shape_cast %8 : vector<8x8xf32> to vector<1x8x8xf32>
    %10 = vector.broadcast %9 : vector<1x8x8xf32> to vector<4x8x8xf32>
    %cst_12 = arith.constant 0.000000e+00 : f32
    %11 = vector.broadcast %cst_12 : f32 to vector<32x32xf32>
    %12 = vector.extract_strided_slice %3 {offsets = [0, 0], sizes = [32, 8], strides = [1, 1]} : vector<32x32xf32> to vector<32x8xf32>
    %13 = vector.shape_cast %12 : vector<32x8xf32> to vector<4x8x8xf32>
    %14 = vector.extract_strided_slice %5 {offsets = [0, 0], sizes = [32, 8], strides = [1, 1]} : vector<32x32xf32> to vector<32x8xf32>
    %15 = vector.shape_cast %14 : vector<32x8xf32> to vector<4x8x8xf32>
    %16 = vector.extract_strided_slice %7 {offsets = [0, 0], sizes = [32, 8], strides = [1, 1]} : vector<32x32xf32> to vector<32x8xf32>
    %17 = vector.shape_cast %16 : vector<32x8xf32> to vector<4x8x8xf32>
    "tpu.trace_start"() <{level = 10 : i32, message = "bqd,bkd->bqk"}> : () -> ()
    %cst_13 = arith.constant dense<0.000000e+00> : vector<4x8x8xf32>
    %18 = tpu.matmul %13, %15, %cst_13 {dimension_numbers = #tpu.dot_dimension_numbers<[2], [2], [1], [1], [0, 0, 0, 1, 1, 1], [0], [0]>} : vector<4x8x8xf32>, vector<4x8x8xf32>, vector<4x8x8xf32> -> vector<4x8x8xf32>
    "tpu.trace_stop"() : () -> ()
    %19 = arith.addf %18, %10 : vector<4x8x8xf32>
    %cst_14 = arith.constant dense<0xFF800000> : vector<4x8xf32>
    %20 = vector.multi_reduction <maximumf>, %19, %cst_14 [2] : vector<4x8x8xf32> to vector<4x8xf32>
    %21 = vector.shape_cast %20 : vector<4x8xf32> to vector<4x8x1xf32>
    %22 = vector.broadcast %21 : vector<4x8x1xf32> to vector<4x8x8xf32>
    %23 = arith.subf %19, %22 : vector<4x8x8xf32>
    %24 = math.exp %23 : vector<4x8x8xf32>
    %cst_15 = arith.constant dense<0.000000e+00> : vector<4x8xf32>
    %25 = vector.multi_reduction <add>, %24, %cst_15 [2] : vector<4x8x8xf32> to vector<4x8xf32>
    %26 = vector.shape_cast %25 : vector<4x8xf32> to vector<4x8x1xf32>
    %27 = tpu.reciprocal %26 {approx = true} : vector<4x8x1xf32> -> vector<4x8x1xf32>
    %28 = vector.broadcast %27 : vector<4x8x1xf32> to vector<4x8x8xf32>
    %29 = arith.mulf %24, %28 : vector<4x8x8xf32>
    "tpu.trace_start"() <{level = 10 : i32, message = "bqk,bkd->bqd"}> : () -> ()
    %cst_16 = arith.constant dense<0.000000e+00> : vector<4x8x8xf32>
    %30 = tpu.matmul %29, %17, %cst_16 {dimension_numbers = #tpu.dot_dimension_numbers<[2], [1], [1], [2], [0, 0, 0, 1, 1, 2], [0], [0]>} : vector<4x8x8xf32>, vector<4x8x8xf32>, vector<4x8x8xf32> -> vector<4x8x8xf32>
    "tpu.trace_stop"() : () -> ()
    %31 = vector.shape_cast %30 : vector<4x8x8xf32> to vector<32x8xf32>
    %c0_17 = arith.constant 0 : index
    %c0_18 = arith.constant 0 : index
    %c0_19 = arith.constant 0 : index
    %32 = vector.load %arg6[%c0_17, %c0_18, %c0_19] : memref<4x8x32xf32, #tpu.memory_space<vmem>>, vector<1x8x32xf32>
    %33 = vector.shape_cast %32 : vector<1x8x32xf32> to vector<8x32xf32>
    %cst_20 = arith.constant dense<0.000000e+00> : vector<32x32xf32>
    %34 = tpu.matmul %31, %33, %cst_20 {dimension_numbers = #tpu.dot_dimension_numbers<[1], [0], [0], [1], [0, 0, 1, 1], [], []>} : vector<32x8xf32>, vector<8x32xf32>, vector<32x32xf32> -> vector<32x32xf32>
    %35 = arith.addf %11, %34 : vector<32x32xf32>
    %36 = vector.extract_strided_slice %3 {offsets = [0, 8], sizes = [32, 8], strides = [1, 1]} : vector<32x32xf32> to vector<32x8xf32>
    %37 = vector.shape_cast %36 : vector<32x8xf32> to vector<4x8x8xf32>
    %38 = vector.extract_strided_slice %5 {offsets = [0, 8], sizes = [32, 8], strides = [1, 1]} : vector<32x32xf32> to vector<32x8xf32>
    %39 = vector.shape_cast %38 : vector<32x8xf32> to vector<4x8x8xf32>
    %40 = vector.extract_strided_slice %7 {offsets = [0, 8], sizes = [32, 8], strides = [1, 1]} : vector<32x32xf32> to vector<32x8xf32>
    %41 = vector.shape_cast %40 : vector<32x8xf32> to vector<4x8x8xf32>
    "tpu.trace_start"() <{level = 10 : i32, message = "bqd,bkd->bqk"}> : () -> ()
    %cst_21 = arith.constant dense<0.000000e+00> : vector<4x8x8xf32>
    %42 = tpu.matmul %37, %39, %cst_21 {dimension_numbers = #tpu.dot_dimension_numbers<[2], [2], [1], [1], [0, 0, 0, 1, 1, 1], [0], [0]>} : vector<4x8x8xf32>, vector<4x8x8xf32>, vector<4x8x8xf32> -> vector<4x8x8xf32>
    "tpu.trace_stop"() : () -> ()
    %43 = arith.addf %42, %10 : vector<4x8x8xf32>
    %cst_22 = arith.constant dense<0xFF800000> : vector<4x8xf32>
    %44 = vector.multi_reduction <maximumf>, %43, %cst_22 [2] : vector<4x8x8xf32> to vector<4x8xf32>
    %45 = vector.shape_cast %44 : vector<4x8xf32> to vector<4x8x1xf32>
    %46 = vector.broadcast %45 : vector<4x8x1xf32> to vector<4x8x8xf32>
    %47 = arith.subf %43, %46 : vector<4x8x8xf32>
    %48 = math.exp %47 : vector<4x8x8xf32>
    %cst_23 = arith.constant dense<0.000000e+00> : vector<4x8xf32>
    %49 = vector.multi_reduction <add>, %48, %cst_23 [2] : vector<4x8x8xf32> to vector<4x8xf32>
    %50 = vector.shape_cast %49 : vector<4x8xf32> to vector<4x8x1xf32>
    %51 = tpu.reciprocal %50 {approx = true} : vector<4x8x1xf32> -> vector<4x8x1xf32>
    %52 = vector.broadcast %51 : vector<4x8x1xf32> to vector<4x8x8xf32>
    %53 = arith.mulf %48, %52 : vector<4x8x8xf32>
    "tpu.trace_start"() <{level = 10 : i32, message = "bqk,bkd->bqd"}> : () -> ()
    %cst_24 = arith.constant dense<0.000000e+00> : vector<4x8x8xf32>
    %54 = tpu.matmul %53, %41, %cst_24 {dimension_numbers = #tpu.dot_dimension_numbers<[2], [1], [1], [2], [0, 0, 0, 1, 1, 2], [0], [0]>} : vector<4x8x8xf32>, vector<4x8x8xf32>, vector<4x8x8xf32> -> vector<4x8x8xf32>
    "tpu.trace_stop"() : () -> ()
    %55 = vector.shape_cast %54 : vector<4x8x8xf32> to vector<32x8xf32>
    %c1 = arith.constant 1 : index
    %c0_25 = arith.constant 0 : index
    %c0_26 = arith.constant 0 : index
    %56 = vector.load %arg6[%c1, %c0_25, %c0_26] : memref<4x8x32xf32, #tpu.memory_space<vmem>>, vector<1x8x32xf32>
    %57 = vector.shape_cast %56 : vector<1x8x32xf32> to vector<8x32xf32>
    %cst_27 = arith.constant dense<0.000000e+00> : vector<32x32xf32>
    %58 = tpu.matmul %55, %57, %cst_27 {dimension_numbers = #tpu.dot_dimension_numbers<[1], [0], [0], [1], [0, 0, 1, 1], [], []>} : vector<32x8xf32>, vector<8x32xf32>, vector<32x32xf32> -> vector<32x32xf32>
    %59 = arith.addf %35, %58 : vector<32x32xf32>
    %60 = vector.extract_strided_slice %3 {offsets = [0, 16], sizes = [32, 8], strides = [1, 1]} : vector<32x32xf32> to vector<32x8xf32>
    %61 = vector.shape_cast %60 : vector<32x8xf32> to vector<4x8x8xf32>
    %62 = vector.extract_strided_slice %5 {offsets = [0, 16], sizes = [32, 8], strides = [1, 1]} : vector<32x32xf32> to vector<32x8xf32>
    %63 = vector.shape_cast %62 : vector<32x8xf32> to vector<4x8x8xf32>
    %64 = vector.extract_strided_slice %7 {offsets = [0, 16], sizes = [32, 8], strides = [1, 1]} : vector<32x32xf32> to vector<32x8xf32>
    %65 = vector.shape_cast %64 : vector<32x8xf32> to vector<4x8x8xf32>
    "tpu.trace_start"() <{level = 10 : i32, message = "bqd,bkd->bqk"}> : () -> ()
    %cst_28 = arith.constant dense<0.000000e+00> : vector<4x8x8xf32>
    %66 = tpu.matmul %61, %63, %cst_28 {dimension_numbers = #tpu.dot_dimension_numbers<[2], [2], [1], [1], [0, 0, 0, 1, 1, 1], [0], [0]>} : vector<4x8x8xf32>, vector<4x8x8xf32>, vector<4x8x8xf32> -> vector<4x8x8xf32>
    "tpu.trace_stop"() : () -> ()
    %67 = arith.addf %66, %10 : vector<4x8x8xf32>
    %cst_29 = arith.constant dense<0xFF800000> : vector<4x8xf32>
    %68 = vector.multi_reduction <maximumf>, %67, %cst_29 [2] : vector<4x8x8xf32> to vector<4x8xf32>
    %69 = vector.shape_cast %68 : vector<4x8xf32> to vector<4x8x1xf32>
    %70 = vector.broadcast %69 : vector<4x8x1xf32> to vector<4x8x8xf32>
    %71 = arith.subf %67, %70 : vector<4x8x8xf32>
    %72 = math.exp %71 : vector<4x8x8xf32>
    %cst_30 = arith.constant dense<0.000000e+00> : vector<4x8xf32>
    %73 = vector.multi_reduction <add>, %72, %cst_30 [2] : vector<4x8x8xf32> to vector<4x8xf32>
    %74 = vector.shape_cast %73 : vector<4x8xf32> to vector<4x8x1xf32>
    %75 = tpu.reciprocal %74 {approx = true} : vector<4x8x1xf32> -> vector<4x8x1xf32>
    %76 = vector.broadcast %75 : vector<4x8x1xf32> to vector<4x8x8xf32>
    %77 = arith.mulf %72, %76 : vector<4x8x8xf32>
    "tpu.trace_start"() <{level = 10 : i32, message = "bqk,bkd->bqd"}> : () -> ()
    %cst_31 = arith.constant dense<0.000000e+00> : vector<4x8x8xf32>
    %78 = tpu.matmul %77, %65, %cst_31 {dimension_numbers = #tpu.dot_dimension_numbers<[2], [1], [1], [2], [0, 0, 0, 1, 1, 2], [0], [0]>} : vector<4x8x8xf32>, vector<4x8x8xf32>, vector<4x8x8xf32> -> vector<4x8x8xf32>
    "tpu.trace_stop"() : () -> ()
    %79 = vector.shape_cast %78 : vector<4x8x8xf32> to vector<32x8xf32>
    %c2 = arith.constant 2 : index
    %c0_32 = arith.constant 0 : index
    %c0_33 = arith.constant 0 : index
    %80 = vector.load %arg6[%c2, %c0_32, %c0_33] : memref<4x8x32xf32, #tpu.memory_space<vmem>>, vector<1x8x32xf32>
    %81 = vector.shape_cast %80 : vector<1x8x32xf32> to vector<8x32xf32>
    %cst_34 = arith.constant dense<0.000000e+00> : vector<32x32xf32>
    %82 = tpu.matmul %79, %81, %cst_34 {dimension_numbers = #tpu.dot_dimension_numbers<[1], [0], [0], [1], [0, 0, 1, 1], [], []>} : vector<32x8xf32>, vector<8x32xf32>, vector<32x32xf32> -> vector<32x32xf32>
    %83 = arith.addf %59, %82 : vector<32x32xf32>
    %84 = vector.extract_strided_slice %3 {offsets = [0, 24], sizes = [32, 8], strides = [1, 1]} : vector<32x32xf32> to vector<32x8xf32>
    %85 = vector.shape_cast %84 : vector<32x8xf32> to vector<4x8x8xf32>
    %86 = vector.extract_strided_slice %5 {offsets = [0, 24], sizes = [32, 8], strides = [1, 1]} : vector<32x32xf32> to vector<32x8xf32>
    %87 = vector.shape_cast %86 : vector<32x8xf32> to vector<4x8x8xf32>
    %88 = vector.extract_strided_slice %7 {offsets = [0, 24], sizes = [32, 8], strides = [1, 1]} : vector<32x32xf32> to vector<32x8xf32>
    %89 = vector.shape_cast %88 : vector<32x8xf32> to vector<4x8x8xf32>
    "tpu.trace_start"() <{level = 10 : i32, message = "bqd,bkd->bqk"}> : () -> ()
    %cst_35 = arith.constant dense<0.000000e+00> : vector<4x8x8xf32>
    %90 = tpu.matmul %85, %87, %cst_35 {dimension_numbers = #tpu.dot_dimension_numbers<[2], [2], [1], [1], [0, 0, 0, 1, 1, 1], [0], [0]>} : vector<4x8x8xf32>, vector<4x8x8xf32>, vector<4x8x8xf32> -> vector<4x8x8xf32>
    "tpu.trace_stop"() : () -> ()
    %91 = arith.addf %90, %10 : vector<4x8x8xf32>
    %cst_36 = arith.constant dense<0xFF800000> : vector<4x8xf32>
    %92 = vector.multi_reduction <maximumf>, %91, %cst_36 [2] : vector<4x8x8xf32> to vector<4x8xf32>
    %93 = vector.shape_cast %92 : vector<4x8xf32> to vector<4x8x1xf32>
    %94 = vector.broadcast %93 : vector<4x8x1xf32> to vector<4x8x8xf32>
    %95 = arith.subf %91, %94 : vector<4x8x8xf32>
    %96 = math.exp %95 : vector<4x8x8xf32>
    %cst_37 = arith.constant dense<0.000000e+00> : vector<4x8xf32>
    %97 = vector.multi_reduction <add>, %96, %cst_37 [2] : vector<4x8x8xf32> to vector<4x8xf32>
    %98 = vector.shape_cast %97 : vector<4x8xf32> to vector<4x8x1xf32>
    %99 = tpu.reciprocal %98 {approx = true} : vector<4x8x1xf32> -> vector<4x8x1xf32>
    %100 = vector.broadcast %99 : vector<4x8x1xf32> to vector<4x8x8xf32>
    %101 = arith.mulf %96, %100 : vector<4x8x8xf32>
    "tpu.trace_start"() <{level = 10 : i32, message = "bqk,bkd->bqd"}> : () -> ()
    %cst_38 = arith.constant dense<0.000000e+00> : vector<4x8x8xf32>
    %102 = tpu.matmul %101, %89, %cst_38 {dimension_numbers = #tpu.dot_dimension_numbers<[2], [1], [1], [2], [0, 0, 0, 1, 1, 2], [0], [0]>} : vector<4x8x8xf32>, vector<4x8x8xf32>, vector<4x8x8xf32> -> vector<4x8x8xf32>
    "tpu.trace_stop"() : () -> ()
    %103 = vector.shape_cast %102 : vector<4x8x8xf32> to vector<32x8xf32>
    %c3 = arith.constant 3 : index
    %c0_39 = arith.constant 0 : index
    %c0_40 = arith.constant 0 : index
    %104 = vector.load %arg6[%c3, %c0_39, %c0_40] : memref<4x8x32xf32, #tpu.memory_space<vmem>>, vector<1x8x32xf32>
    %105 = vector.shape_cast %104 : vector<1x8x32xf32> to vector<8x32xf32>
    %cst_41 = arith.constant dense<0.000000e+00> : vector<32x32xf32>
    %106 = tpu.matmul %103, %105, %cst_41 {dimension_numbers = #tpu.dot_dimension_numbers<[1], [0], [0], [1], [0, 0, 1, 1], [], []>} : vector<32x8xf32>, vector<8x32xf32>, vector<32x32xf32> -> vector<32x32xf32>
    %107 = arith.addf %83, %106 : vector<32x32xf32>
    %c0_42 = arith.constant 0 : index
    %c0_43 = arith.constant 0 : index
    %108 = vector.load %arg7[%c0_42, %c0_43] : memref<1x32xf32, #tpu.memory_space<vmem>>, vector<1x32xf32>
    %109 = vector.broadcast %108 : vector<1x32xf32> to vector<32x32xf32>
    %110 = arith.addf %107, %109 : vector<32x32xf32>
    %111 = vector.shape_cast %110 : vector<32x32xf32> to vector<4x8x32xf32>
    %c0_44 = arith.constant 0 : index
    %c0_45 = arith.constant 0 : index
    %c0_46 = arith.constant 0 : index
    %112 = vector.load %arg8[%c0_44, %c0_45, %c0_46] : memref<4x8x32xf32, #tpu.memory_space<vmem>>, vector<4x8x32xf32>
    tpu.vector_store %arg8[%c0_44, %c0_45, %c0_46], %111 {strides = array<i32>} : memref<4x8x32xf32, #tpu.memory_space<vmem>>, vector<4x8x32xf32>,
    return
  }
  func.func @transform_0(%arg0: i32) -> (i32, i32, i32) {
    %c0_i32 = arith.constant 0 : i32
    %c0_i32_0 = arith.constant 0 : i32
    %c0_i32_1 = arith.constant 0 : i32
    return %arg0, %c0_i32, %c0_i32_0 : i32, i32, i32
  }
  func.func @transform_1(%arg0: i32) -> (i32, i32) {
    %c0_i32 = arith.constant 0 : i32
    %c0_i32_0 = arith.constant 0 : i32
    %c0_i32_1 = arith.constant 0 : i32
    return %c0_i32, %c0_i32_0 : i32, i32
  }
  func.func @transform_2(%arg0: i32) -> (i32, i32) {
    %c0_i32 = arith.constant 0 : i32
    %c0_i32_0 = arith.constant 0 : i32
    %c0_i32_1 = arith.constant 0 : i32
    return %c0_i32, %c0_i32_0 : i32, i32
  }
  func.func @transform_3(%arg0: i32) -> (i32, i32) {
    %c0_i32 = arith.constant 0 : i32
    %c0_i32_0 = arith.constant 0 : i32
    %c0_i32_1 = arith.constant 0 : i32
    return %c0_i32, %c0_i32_0 : i32, i32
  }
  func.func @transform_4(%arg0: i32) -> (i32, i32) {
    %c0_i32 = arith.constant 0 : i32
    %c0_i32_0 = arith.constant 0 : i32
    %c0_i32_1 = arith.constant 0 : i32
    return %c0_i32, %c0_i32_0 : i32, i32
  }
  func.func @transform_5(%arg0: i32) -> (i32, i32, i32) {
    %c0_i32 = arith.constant 0 : i32
    %c0_i32_0 = arith.constant 0 : i32
    %c0_i32_1 = arith.constant 0 : i32
    %c0_i32_2 = arith.constant 0 : i32
    return %c0_i32, %c0_i32_0, %c0_i32_1 : i32, i32, i32
  }
  func.func @transform_6(%arg0: i32) -> (i32, i32) {
    %c0_i32 = arith.constant 0 : i32
    %c0_i32_0 = arith.constant 0 : i32
    %c0_i32_1 = arith.constant 0 : i32
    return %c0_i32, %c0_i32_0 : i32, i32
  }
  func.func @transform_7(%arg0: i32) -> (i32, i32, i32) {
    %c0_i32 = arith.constant 0 : i32
    %c0_i32_0 = arith.constant 0 : i32
    %c0_i32_1 = arith.constant 0 : i32
    return %arg0, %c0_i32, %c0_i32_0 : i32, i32, i32
  }
}

</mosaic_0001>

<bundles_post_ra>
// kernel: tpu_custom_call.1
= control target key start
LH: loop header
LB: loop body
LE: loop exit
PB: predicated region body
PF: predicated region fallthrough
CT: control target
= control target key end

     0   :  { %s5397_s0 = inlined_call_operand.hbm [shape: f32[8,8,32], index: 0, kind: input, shape index: {}]   ;;  %s5398_s1 = inlined_call_operand.hbm [shape: f32[8,8], index: 1, kind: input, shape index: {}]   ;;  %s5399_s2 = inlined_call_operand.hbm [shape: f32[32,32], index: 2, kind: input, shape index: {}]   ;;  %s5400_s3 = inlined_call_operand.hbm [shape: f32[32,32], index: 3, kind: input, shape index: {}]   ;;  %s5401_s4 = inlined_call_operand.hbm [shape: f32[32,32], index: 4, kind: input, shape index: {}]   ;;  %s5402_s5 = inlined_call_operand.hbm [shape: f32[4,8,32], index: 5, kind: input, shape index: {}]   ;;  %s5403_s6 = inlined_call_operand.vmem [shape: f32[1,32], index: 6, kind: input, shape index: {}]   ;;  %s5404_s7 = inlined_call_operand.hbm [shape: f32[8,8,32], index: 7, kind: output, shape index: {}]  }
   0x1   :  { %5411 = sst [smem:[#allocation19_spill]] %s5398_s1 }
   0x2   :  { %12 = vsyncpa [#allocation3], 0 }
   0x3   :  { %14 = vsyncpa [#allocation3 + $0x1], 0 }
   0x4   :  { %15 = vsyncpa [#allocation6], 0 }
   0x5   :  { %16 = vsyncpa [#allocation9], 0 }
   0x6   :  { %17 = vsyncpa [#allocation12], 0 }
   0x7   :  { %18 = vsyncpa [#allocation4], 0 }
   0x8   :  { %20 = vsyncpa [#allocation4 + $0x1], 0  ;;  %s4748_s24 = smov 0   ;;  %s4750_s25 = smov 0  }
   0x9   :  { %s4752_s26 = smov 0   ;;  %s4754_s27 = smov 0  }
   0xa LB: > { %s4692_s28 = smov [#allocation5]   ;;  %s4769_s30 = sadd.s32 4294967295, %s4690_s27   ;;  %s4690_s27 = sphi %s4754_s27, %s5436_s27   ;;  %s4686_s26 = sphi %s4752_s26, %s5435_s26   ;;  %s4682_s25 = sphi %s4750_s25, %s5434_s25   ;;  %s4678_s24 = sphi %s4748_s24, %s5433_s24  }
   0xb   : > { %s222_s29 = sshll.u32 %s4692_s28, 4  ;;  %p3834_p0 = scmp.ge.s32.totalorder %s4690_s27, 1  ;;  %s223_s29 = int_to_ptr.vmem [resolvable:$true] %s222_s29 }
   0xc   : > { %p5406_p1 = scmp.eq.s32.totalorder %s4769_s30, 0  ;;  %p209_p2 = scmp.lt.s32.totalorder %s4690_s27, 3 }
   0xd   : > { %s4693_s9 = smov [#allocation8]   ;;  %s4694_s12 = smov [#allocation7]  }
   0xe   : > { %p4774_p3 = pnand %p3834_p0, %p209_p2  ;;  %s245_s10 = sshll.u32 %s4693_s9, 4  ;;  %s4787_s10 = int_to_ptr.vmem [resolvable:$true] %s245_s10 }
   0xf   : > { %s232_s13 = sshll.u32 %s4694_s12, 4  ;;  %s4467_s15 = scalar_lea.vmem %s223_s29, 128  ;;  %s4789_s13 = int_to_ptr.vmem [resolvable:$true] %s232_s13 }
  0x10   : > { %s5412_s8 = scalar_select %p4774_p3, 1, 0 }
  0x11   : > { %p4310_p5 = pneg %p4774_p3  ;;  %p4468_p8 = scmp.ne.s32.totalorder %s223_s29, %s4467_s15 }
  0x12   : > { %p4475_p11 = scmp.lt.s32.totalorder %s223_s29, %s223_s29  ;;  %p4476_p12 = scmp.lt.s32.totalorder %s4467_s15, %s4467_s15 }
  0x13   : > { %p4783_p6 = pnand %p4310_p5, %p5406_p1 }
  0x14   : > { %p4477_p13 = por %p4476_p12, %p4475_p11 }
  0x15   : > { %p4793_p7 = pneg %p4783_p6 }
  0x17   : > { %p4470_p9 = pnand %p4468_p8, %p4793_p7 }
  0x19   : > { %p4471_p10 = pneg %p4470_p9 }
  0x1b   : > { %p4478_p0 = pnand %p4477_p13, %p4471_p10 }
  0x1d   : > { %4481 = shalt.err (!%p4478_p0)
}
  0x1e   : > { %s5415_s1 = sld [smem:[#allocation19_spill]]  ;;  %s4493_s18 = scalar_lea.vmem %s4787_s10, 512 }
  0x1f   : > { %p4494_p2 = scmp.ne.s32.totalorder %s4787_s10, %s4493_s18  ;;  %p4501_p9 = scmp.lt.s32.totalorder %s4787_s10, %s4787_s10 }
  0x20   : > { %p4502_p11 = scmp.lt.s32.totalorder %s4493_s18, %s4493_s18 }
  0x21   : > { %p4496_p5 = pnand %p4494_p2, %p4793_p7 }
  0x22   : > { %p4503_p10 = por %p4502_p11, %p4501_p9 }
  0x23   : > { %p4497_p8 = pneg %p4496_p5 }
  0x24   : > { %4313 = dma.hbm_to_vmem [thread:$0]  (!%p4783_p6), %s5415_s1, 128, %s223_s29, [#allocation6]  }
  0x25   : > { %p4504_p12 = pnand %p4503_p10, %p4497_p8 }
  0x27   : > { %4507 = shalt.err (!%p4504_p12)
}
  0x28   : > { %s5405_s19 = smov 128   ;;  %s5407_s20 = smov 8  }
  0x29   : > { %4319 = dma.hbm_to_vmem [thread:$0]  (!%p4783_p6), %s5400_s3, 512, %s4787_s10, [#allocation9], %s5405_s19, %s5405_s19, %s5407_s20  }
  0x2a   : > { %s4519_s23 = scalar_lea.vmem %s4789_s13, 512  ;;  %p4527_p5 = scmp.lt.s32.totalorder %s4789_s13, %s4789_s13 }
  0x2b   : > { %p4520_p13 = scmp.ne.s32.totalorder %s4789_s13, %s4519_s23  ;;  %p4528_p8 = scmp.lt.s32.totalorder %s4519_s23, %s4519_s23 }
  0x2d   : > { %p4522_p0 = pnand %p4520_p13, %p4793_p7  ;;  %p4529_p9 = por %p4528_p8, %p4527_p5 }
  0x2f   : > { %p4523_p2 = pneg %p4522_p0 }
  0x31   : > { %p4530_p11 = pnand %p4529_p9, %p4523_p2 }
  0x33   : > { %4533 = shalt.err (!%p4530_p11)
}
  0x34   : > { %4316 = dma.hbm_to_vmem [thread:$0]  (!%p4783_p6), %s5399_s2, 512, %s4789_s13, [#allocation6], %s5405_s19, %s5405_s19, %s5407_s20  }
  0x35   : > { %s4697_s9 = smov [#allocation10]   ;;  %s4698_s12 = smov [#allocation11]  }
  0x36   : > { %s258_s10 = sshll.u32 %s4697_s9, 4  ;;  %s271_s15 = sshll.u32 %s4698_s12, 4  ;;  %s259_s10 = int_to_ptr.vmem [resolvable:$true] %s258_s10  ;;  %s272_s15 = int_to_ptr.vmem [resolvable:$true] %s271_s15 }
  0x37   : > { %s4545_s16 = scalar_lea.vmem %s259_s10, 512  ;;  %p4553_p0 = scmp.lt.s32.totalorder %s259_s10, %s259_s10 }
  0x38   : > { %p4546_p10 = scmp.ne.s32.totalorder %s259_s10, %s4545_s16  ;;  %p4554_p2 = scmp.lt.s32.totalorder %s4545_s16, %s4545_s16 }
  0x3a   : > { %p4548_p12 = pnand %p4546_p10, %p4793_p7  ;;  %p4555_p5 = por %p4554_p2, %p4553_p0 }
  0x3c   : > { %p4549_p13 = pneg %p4548_p12 }
  0x3e   : > { %p4556_p8 = pnand %p4555_p5, %p4549_p13 }
  0x40   : > { %4559 = shalt.err (!%p4556_p8)
}
  0x41   : > { %4322 = dma.hbm_to_vmem [thread:$0]  (!%p4783_p6), %s5401_s4, 512, %s259_s10, [#allocation9], %s5405_s19, %s5405_s19, %s5407_s20  }
  0x42   : > { %s4571_s18 = scalar_lea.vmem %s272_s15, 512  ;;  %p4579_p12 = scmp.lt.s32.totalorder %s272_s15, %s272_s15 }
  0x43   : > { %p4572_p9 = scmp.ne.s32.totalorder %s272_s15, %s4571_s18  ;;  %p4580_p0 = scmp.lt.s32.totalorder %s4571_s18, %s4571_s18 }
  0x45   : > { %p4574_p11 = pnand %p4572_p9, %p4793_p7  ;;  %p4581_p13 = por %p4580_p0, %p4579_p12 }
  0x47   : > { %p4575_p10 = pneg %p4574_p11 }
  0x49   : > { %p4582_p2 = pnand %p4581_p13, %p4575_p10 }
  0x4b   : > { %4585 = shalt.err (!%p4582_p2)
}
  0x4c   : > { %4325 = dma.hbm_to_vmem [thread:$0]  (!%p4783_p6), %s5402_s5, 512, %s272_s15, [#allocation12], %s5405_s19, %s5405_s19, %s5407_s20  }
  0x4d   : > { %s3833_s11 = sadd.s32 4294967294, %s4690_s27   ;;  %s4856_s14 = sadd.s32 1, %s4690_s27  }
  0x4e   : > { %s33_s23 = sadd.s32 1, %s4686_s26  ;;  %s30_s28 = ssub.s32 %s4690_s27, %s4856_s14 }
  0x4f   : > { %p40_p7 = scmp.ne.s32.totalorder %s4686_s26, %s4682_s25  ;;  %p31_p5 = scmp.eq.s32.totalorder %s30_s28, 0 }
  0x50   : > { %p41_p8 = scmp.eq.s32.totalorder %s4690_s27, 0  ;;  %p46_p9 = scmp.ne.s32.totalorder %s4682_s25, %s4678_s24 }
  0x51   : > { %p196_p11 = scmp.eq.s32.totalorder %s4769_s30, 1  ;;  %p202_p0 = scmp.eq.s32.totalorder %s3833_s11, 1 }
  0x52   : > { %s4868_s29 = scalar_select %p31_p5, %s4686_s26, %s33_s23  }
  0x53   : > { %p42_p10 = por %p41_p8, %p40_p7  ;;  %p4872_p12 = por %p5406_p1, %p46_p9 }
  0x54   : > { %p4876_p6 = por %p196_p11, %p40_p7  ;;  %p4339_p13 = scmp.lt.s32.totalorder %s4690_s27, 2 }
  0x55   : > { %s5416_s9 = scalar_select %p4872_p12, 1, 0 }
  0x56   : > { %s5417_s10 = scalar_select %p4876_p6, 1, 0 }
  0x57   : > { %s288_s12 = sand.u32 1, %s4686_s26   ;;  %p4882_p2 = por %p202_p0, %p46_p9 }
  0x58   : > { %s3841_s16 = sshll.u32 %s288_s12, 5  ;;  %s3934_s13 = sshll.u32 %s4690_s27, 9 }
  0x59   : > { %s5418_s15 = scalar_select %p4882_p2, 1, 0 }
  0x5a   : > { %s4890_s21 = scalar_lea.hbm %s5397_s0, %s3934_s13  ;;  %s292_s22 = scalar_lea.vmem [#allocation2], %s3841_s16 }
  0x5b   : > { %s299_s23 = sshll.u32 %s292_s22, 4  ;;  %p4892_p7 = pnand %p4339_p13, %p42_p10  ;;  %s4896_s23 = int_to_ptr.vmem [resolvable:$true] %s299_s23 }
  0x5c   : > { %s4898_s28 = scalar_lea.sflag [#allocation3], %s288_s12  ;;  %s4586_s19 = scalar_lea.hbm %s4890_s21, 512 }
  0x5d   : > { %p4587_p5 = scmp.ne.s32.totalorder %s4890_s21, %s4586_s19  ;;  %p4588_p8 = pneg %p4892_p7 }
  0x5e   : > { %s4591_s16 = scalar_lea.hbm %s5397_s0, 1024  ;;  %p4592_p10 = scmp.lt.s32.totalorder %s4890_s21, %s5397_s0 }
  0x5f   : > { %p4589_p9 = pnand %p4588_p8, %p4587_p5  ;;  %p4593_p0 = scmp.lt.s32.totalorder %s4591_s16, %s4586_s19 }
  0x61   : > { %p4590_p11 = pneg %p4589_p9  ;;  %p4594_p13 = por %p4593_p0, %p4592_p10 }
  0x63   : > { %p4595_p4 = pnand %p4594_p13, %p4590_p11 }
  0x65   : > { %4598 = shalt.err (!%p4595_p4)
}
  0x66   : > { %s4599_s12 = scalar_lea.vmem %s4896_s23, 512  ;;  %s4699_s20 = smov [#allocation2]  }
  0x67   : > { %p4600_p1 = scmp.ne.s32.totalorder %s4896_s23, %s4599_s12  ;;  %s4604_s1 = sshll.u32 %s4699_s20, 4  ;;  %s4605_s1 = int_to_ptr.vmem [resolvable:$false] %s4604_s1 }
  0x68   : > { %s4606_s13 = scalar_lea.vmem %s4605_s1, 1024  ;;  %p4607_p9 = scmp.lt.s32.totalorder %s4896_s23, %s4605_s1 }
  0x69   : > { %p4602_p2 = pnand %p4600_p1, %p4588_p8  ;;  %p4608_p6 = scmp.lt.s32.totalorder %s4606_s13, %s4599_s12 }
  0x6b   : > { %p4603_p5 = pneg %p4602_p2  ;;  %p4609_p12 = por %p4608_p6, %p4607_p9 }
  0x6d   : > { %p4610_p3 = pnand %p4609_p12, %p4603_p5 }
  0x6f   : > { %4613 = shalt.err (!%p4610_p3)
}
  0x70   : > { %s5420_s19 = smov 8   ;;  %s5421_s17 = smov 128  }
  0x71   : > { %4329 = dma.hbm_to_vmem [thread:$0]  (!%p4892_p7), %s4890_s21, 512, %s4896_s23, %s4898_s28, %s5421_s17, %s5421_s17, %s5420_s19  }
  0x72   : > { %p5422_p1 = scmp.ne.s32.totalorder %s5412_s8, 0 }
  0x73   : > { %s4925_s20 = sand.u32 (!%p5422_p1), 1, %s4682_s25   ;;  %p5423_p3 = scmp.ne.s32.totalorder (!%p5422_p1), %s5416_s9, 0 }
  0x74   : > { %311 = sbr.rel (%p5422_p1) target bundleno = 3309 (0xced), region = 48  ;;  %s3845_s1 = sshll.u32 (!%p5422_p1), %s4925_s20, 5 }
  0x75   : > { %s314_s16 = scalar_lea.sflag (!%p5422_p1), [#allocation3], %s4925_s20  ;;  %s4931_s11 = scalar_lea.vmem (!%p5422_p1), [#allocation2], %s3845_s1 }
  0x79   : > { %4657 = dma.done.wait (%p5423_p3), %s314_s16, 512  }
  0x7a   : > { %4659 = vsyncadd (%p5423_p3), %s314_s16, 4294966784  ;;  %p5424_p4 = scmp.eq.s32.totalorder %s4769_s30, 0 }
  0x7c   : > { %4661 = dma.done.wait (%p5424_p4), [#allocation6], 640   ;;  %p5425_p12 = pmov %p5424_p4 }
  0x7d   : > { %p5426_p6 = pmov %p5424_p4 }
  0x7e   : > { %4663 = vsyncadd (%p5425_p12), [#allocation6], 4294966656 }
  0x7f   : > { %4665 = dma.done.wait (%p5426_p6), [#allocation9], 1024   ;;  %p5427_p2 = pmov %p5424_p4 }
  0x81   : > { %4667 = vsyncadd (%p5427_p2), [#allocation9], 4294966272  ;;  %p5428_p7 = pmov %p5427_p2 }
  0x82   : > { %p5429_p8 = pmov %p5427_p2 }
  0x83   : > { %4669 = dma.done.wait (%p5428_p7), [#allocation12], 512  }
  0x84   : > { %4671 = vsyncadd (%p5429_p8), [#allocation12], 4294966784  ;;  %v479_v0 = vld [vmem:[#allocation8 + $0x18] sm:$0xff]  ;;  %v478_v2 = vld [vmem:[#allocation8 + $0x10] sm:$0xff]  ;;  %vm378_vm0 = vcmask 261120   ;;  %v4700_v16 = vmov 0.0  }
  0x85   : > { %v377_v1 = vld [vmem:[#allocation7 + $0x18] sm:$0xff]  ;;  %4058 = vmatprep.subr.mxu1 %v479_v0  ;;  %v376_v3 = vld [vmem:[#allocation7 + $0x10] sm:$0xff]  ;;  %v477_v4 = vld [vmem:[#allocation8 + $0x8] sm:$0xff]  ;;  %vm4701_vm1 = vmmov 0   ;;  %vm655_vm2 = vcmask 64512   ;;  %s4702_s8 = smov 120  }
  0x86   : > { %4044 = vmatprep.subr.mxu0 %v377_v1  ;;  %4059 = vmatpush3.msra.mxu1 %v479_v0  ;;  %v375_v5 = vld [vmem:[#allocation7 + $0x8] sm:$0xff]  ;;  %v476_v6 = vld [vmem:[#allocation8] sm:$0xff]  ;;  %v370_v7 = vld [vmem:[%s4931_s11] sm:$0xff]  ;;  %s4703_s9 = smov 112   ;;  %s4704_s21 = smov 104  }
  0x87   : > { %4045 = vmatpush3.msra.mxu0 %v377_v1  ;;  %4060 = vmatprep.subr.mxu1 %v478_v2  ;;  %v374_v8 = vld [vmem:[#allocation7] sm:$0xff]  ;;  %v372_v10 = vld [vmem:[%s4931_s11 + $0x10] sm:$0xff]  ;;  %v568_v11 = vld [vmem:[#allocation10 + $0x18] sm:$0xff]  ;;  %s367_s18 = scalar_lea.vmem [#allocation13], %s3845_s1  ;;  %s3935_s12 = sshll.u32 %s4769_s30, 9 }
  0x88   : > { %4046 = vmatprep.subr.mxu0 %v376_v3  ;;  %4061 = vmatpush3.msra.mxu1 %v478_v2  ;;  %v371_v9 = vld [vmem:[%s4931_s11 + $0x8] sm:$0xff]  ;;  %v373_v12 = vld [vmem:[%s4931_s11 + $0x18] sm:$0xff]  ;;  %v566_v14 = vld [vmem:[#allocation10 + $0x8] sm:$0xff]  ;;  %s3712_s22 = sshll.u32 %s367_s18, 4  ;;  %s5352_s17 = scalar_lea.hbm %s5404_s7, %s3935_s12  ;;  %s5346_s22 = int_to_ptr.vmem [resolvable:$true] %s3712_s22 }
  0x89   : > { %4047 = vmatpush3.msra.mxu0 %v376_v3  ;;  %4062 = vmatprep.subr.mxu1 %v477_v4  ;;  %v567_v13 = vld [vmem:[#allocation10 + $0x10] sm:$0xff]  ;;  %v565_v15 = vld [vmem:[#allocation10] sm:$0xff]  ;;  %v5027_v29 = vld [vmem:[#allocation5] sm:$0xff]  ;;  %s3699_s30 = scalar_lea.sflag [#allocation4], %s4925_s20  ;;  %s4614_s1 = scalar_lea.vmem %s5346_s22, 512 }
  0x8a   : > { %4048 = vmatprep.subr.mxu0 %v375_v5  ;;  %4063 = vmatpush3.msra.mxu1 %v477_v4  ;;  %p4615_p11 = scmp.ne.s32.totalorder %s5346_s22, %s4614_s1  ;;  %p5430_p10 = scmp.ne.s32.totalorder %s5417_s10, 0 }
  0x8b   : > { %4049 = vmatpush3.msra.mxu0 %v375_v5  ;;  %4064 = vmatprep.subr.mxu1 %v476_v6  ;;  %s4705_s16 = smov [#allocation13]  }
  0x8c   : > { %4066 = vmatprep.mubr.msk.f32.mxu1 %vm378_vm0, %v370_v7  ;;  %4065 = vmatpush3.msra.mxu1 %v476_v6  ;;  %p4616_p0 = pnand %p4615_p11, %p5430_p10  ;;  %s4618_s11 = sshll.u32 %s4705_s16, 4  ;;  %s4619_s11 = int_to_ptr.vmem [resolvable:$false] %s4618_s11 }
  0x8d   : > { %4050 = vmatprep.subr.mxu0 %v374_v8  ;;  %4067 = vmatmul.mubr.msk.f32.vlgmr.msra.gmra.mxu1 %vm378_vm0, %v371_v9  ;;  %p4621_p5 = scmp.lt.s32.totalorder %s5346_s22, %s4619_s11 }
  0x8e   : > { %4051 = vmatpush3.msra.mxu0 %v374_v8  ;;  %4052 = vmatprep.mubr.msk.f32.mxu0 %vm378_vm0, %v370_v7  ;;  %p4617_p13 = pneg %p4616_p0 }
  0x8f   : > { %4069 = vmatprep.mubr.msk.f32.mxu1 %vm378_vm0, %v372_v10  ;;  %4053 = vmatmul.mubr.msk.f32.vlgmr.msra.gmra.mxu0 %vm378_vm0, %v371_v9 }
  0x90   : > { %4278 = vmatprep.subr.mxu1 %v568_v11  ;;  %4055 = vmatprep.mubr.msk.f32.mxu0 %vm378_vm0, %v372_v10 }
  0x91   : > { %4282 = vmatpush3.msra.mxu1 %v568_v11  ;;  %4072 = vmatprep.subr.mxu0 %v568_v11 }
  0x92   : > { %4070 = vmatmul.mubr.msk.f32.gmra.mxu1 %vm378_vm0, %v373_v12  ;;  %4279 = vmatprep.subr.mxu1 %v567_v13 }
  0x93   : > { %4283 = vmatpush3.msra.mxu1 %v567_v13  ;;  %4056 = vmatmul.mubr.msk.f32.gmra.mxu0 %vm378_vm0, %v373_v12 }
  0x94   : > { %4280 = vmatprep.subr.mxu1 %v566_v14  ;;  %4073 = vmatpush3.msra.mxu0 %v568_v11 }
  0x95   : > { %4284 = vmatpush3.msra.mxu1 %v566_v14  ;;  %4074 = vmatprep.subr.mxu0 %v567_v13 }
  0x96   : > { %4281 = vmatprep.subr.mxu1 %v565_v15  ;;  %4083 = vmatprep.mubr.msk.f32.mxu1 %vm378_vm0, %v372_v10 }
  0x97   : > { %4285 = vmatpush3.msra.mxu1 %v565_v15  ;;  %4075 = vmatpush3.msra.mxu0 %v567_v13 }
  0x98   : > { %4084 = vmatmul.mubr.msk.f32.vlgmr.msra.gmra.mxu1 %vm378_vm0, %v373_v12  ;;  %4076 = vmatprep.subr.mxu0 %v566_v14 }
  0x99   : > { %4080 = vmatprep.mubr.msk.f32.mxu0 %vm378_vm0, %v370_v7  ;;  %4077 = vmatpush3.msra.mxu0 %v566_v14 }
  0x9a   : > { %4078 = vmatprep.subr.mxu0 %v565_v15  ;;  %4086 = vmatprep.subr.mxu1 %v4700_v16 }
  0x9b   : > { %4079 = vmatpush3.msra.mxu0 %v565_v15  ;;  %4088 = vmatprep.mubr.msk.f32.mxu1 %vm4701_vm1, %v4700_v16 }
  0x9c   : > { %4081 = vmatmul.mubr.msk.f32.vlgmr.msra.gmra.mxu0 %vm378_vm0, %v371_v9  ;;  %4096 = vmatprep.subr.mxu0 %v4700_v16 }
  0x9d   : > { %4098 = vmatprep.mubr.msk.f32.mxu0 %vm4701_vm1, %v4700_v16 }
 0x14d   : > { %v4971_v17 = vpop.f32.mrf.mxu1 }
 0x14f   : > { %v4973_v18 = vpop.f32.mrf.mxu0  ;;  %v4975_v19 = vpop.f32.mrf.mxu1 }
 0x150   : > { %4087 = vmatpush3.xpose.msk.msra.mxu1 %vm655_vm2, %v4975_v19 }
 0x151   : > { %v4979_v20 = vpop.f32.mrf.mxu0  ;;  %4091 = vmatprep.subr.mxu1 %v4700_v16 }
 0x152   : > { %v4981_v21 = vpop.f32.mrf.mxu1 }
 0x153   : > { %4089 = vmatmul.mubr.msk.f32.vlgmr.msra.gmra.mxu1 %vm655_vm2, %v4979_v20  ;;  %v4988_v23 = vpop.f32.mrf.mxu0 }
 0x154   : > { %v4984_v22 = vpop.f32.mrf.mxu1  ;;  %4092 = vmatpush3.xpose.msk.msra.mxu1 %vm655_vm2, %v4971_v17  ;;  %4093 = vmatprep.mubr.msk.f32.mxu1 %vm4701_vm1, %v4700_v16 }
 0x155   : > { %4097 = vmatpush3.xpose.msk.msra.mxu0 %vm655_vm2, %v4984_v22  ;;  %v4994_v24 = vpop.f32.mrf.mxu0  ;;  %4101 = vmatprep.subr.mxu1 %v4700_v16 }
 0x156   : > { %4106 = vmatprep.subr.mxu0 %v4700_v16 }
 0x157   : > { %4094 = vmatmul.mubr.msk.f32.vlgmr.msra.gmra.mxu1 %vm655_vm2, %v4973_v18 }
 0x158   : > { %4099 = vmatmul.mubr.msk.f32.vlgmr.msra.gmra.mxu0 %vm655_vm2, %v4994_v24  ;;  %4102 = vmatpush3.xpose.msk.msra.mxu1 %vm655_vm2, %v4981_v21  ;;  %v5023_v27 = vpop.f32.mrf.mxu1 }
 0x159   : > { %4103 = vmatprep.mubr.msk.f32.mxu1 %vm4701_vm1, %v4700_v16  ;;  %4111 = vmatprep.subr.mxu1 %v4700_v16 }
 0x15a   : > { %4108 = vmatprep.mubr.msk.f32.mxu0 %vm4701_vm1, %v4700_v16  ;;  %v5025_v28 = vpop.f32.mrf.mxu1 }
 0x15b   : > { %4104 = vmatmul.mubr.msk.f32.vlgmr.msra.gmra.mxu1 %vm655_vm2, %v4988_v23 }
 0x15c   : > { %v5013_v25 = vpop.f32.mrf.mxu0  ;;  %4113 = vmatprep.mubr.msk.f32.mxu1 %vm4701_vm1, %v4700_v16 }
 0x15d   : > { %4112 = vmatpush3.msra.mxu1 %v5013_v25 }
 0x15e   : > { %4121 = vmatprep.subr.mxu1 %v4700_v16  ;;  %v5019_v26 = vpop.f32.mrf.mxu0 }
 0x15f   : > { %4107 = vmatpush3.msra.mxu0 %v5019_v26 }
 0x160   : > { %4116 = vmatprep.subr.mxu0 %v4700_v16 }
 0x213   : > { %v728_v30 = vpop.f32.mrf.mxu1 }
 0x214   : > { %v729_v31 = vadd.f32 %v728_v30, %v5027_v29 }
 0x215   : > { %v4090_v32 = vpop.f32.mrf.mxu1 }
 0x216   : > { %v960_v33 = vsel %vm655_vm2, %v729_v31, -inf }
 0x217   : > { %961 = vmax.xlane.f32.xlu0 %v960_v33  ;;  %v804_v34 = vpop.f32.mrf.mxu1 }
 0x218   : > { %v880_v35 = vpop.f32.mrf.mxu0  ;;  %v805_v36 = vadd.f32 %v804_v34, %v5027_v29 }
 0x219   : > { %v881_v37 = vadd.f32 %v880_v35, %v5027_v29  ;;  %v4095_v38 = vpop.f32.mrf.mxu1 }
 0x21a   : > { %v4100_v39 = vpop.f32.mrf.mxu0  ;;  %v963_v40 = vsel %vm655_vm2, %v805_v36, -inf }
 0x21b   : > { %v966_v41 = vsel %vm655_vm2, %v881_v37, -inf  ;;  %964 = vmax.xlane.f32.xlu0 %v963_v40  ;;  %v956_v42 = vpop.f32.mrf.mxu1 }
 0x21c   : > { %967 = vmax.xlane.f32.xlu1 %v966_v41  ;;  %v957_v43 = vadd.f32 %v956_v42, %v5027_v29 }
 0x21d   : > { %v4105_v44 = vpop.f32.mrf.mxu1 }
 0x21e   : > { %v969_v45 = vsel %vm655_vm2, %v957_v43, -inf }
 0x220   : > { %970 = vmax.xlane.f32.xlu1 %v969_v45 }
 0x2a0   : > { %v962_v46 = vpop.xlane.xlu0 %961 }
 0x2a1   : > { %v972_v47 = vsub.f32 %v729_v31, %v962_v46 }
 0x2a3   : > { %v976_v48 = vmul.f32 1.442695, %v972_v47 }
 0x2a4   : > { %v965_v49 = vpop.xlane.xlu0 %964 }
 0x2a5   : > { %v968_v50 = vpop.xlane.xlu1 %967  ;;  %4392 = vpow2.f32 %v976_v48  ;;  %v973_v51 = vsub.f32 %v805_v36, %v965_v49 }
 0x2a6   : > { %v974_v52 = vsub.f32 %v881_v37, %v968_v50 }
 0x2a7   : > { %v978_v53 = vmul.f32 1.442695, %v973_v51 }
 0x2a8   : > { %v980_v54 = vmul.f32 1.442695, %v974_v52 }
 0x2a9   : > { %4394 = vpow2.f32 %v978_v53  ;;  %v971_v61 = vpop.xlane.xlu1 %970 }
 0x2aa   : > { %4396 = vpow2.f32 %v980_v54  ;;  %v975_v62 = vsub.f32 %v957_v43, %v971_v61 }
 0x2ac   : > { %v982_v63 = vmul.f32 1.442695, %v975_v62 }
 0x2ae   : > { %4398 = vpow2.f32 %v982_v63 }
 0x2b2   : > { %v4393_v55 = vpop.eup %4392 }
 0x2b3   : > { %v984_v56 = vsel %vm655_vm2, %v4393_v55, 0.0 }
 0x2b4   : > { %985 = vadd.xlane.f32.xlu0 %v984_v56 }
 0x2b6   : > { %v4395_v57 = vpop.eup %4394 }
 0x2b7   : > { %v4397_v58 = vpop.eup %4396  ;;  %v987_v59 = vsel %vm655_vm2, %v4395_v57, 0.0 }
 0x2b8   : > { %988 = vadd.xlane.f32.xlu1 %v987_v59  ;;  %v990_v60 = vsel %vm655_vm2, %v4397_v58, 0.0 }
 0x2b9   : > { %991 = vadd.xlane.f32.xlu0 %v990_v60 }
 0x2bb   : > { %v4399_v0 = vpop.eup %4398 }
 0x2bc   : > { %v993_v1 = vsel %vm655_vm2, %v4399_v0, 0.0 }
 0x2c9   : > { %1377 = vrot.lane.b32.xlu1 %v4971_v17, %s4702_s8 }
 0x2cd   : > { %1297 = vrot.lane.b32.xlu1 %v4979_v20, %s4702_s8 }
 0x2cf   : > { %1299 = vrot.lane.b32.xlu0 %v4975_v19, %s4702_s8 }
 0x2d1   : > { %1375 = vrot.lane.b32.xlu1 %v4973_v18, %s4702_s8 }
 0x2d3   : > { %1455 = vrot.lane.b32.xlu0 %v4984_v22, %s4702_s8 }
 0x2d5   : > { %1533 = vrot.lane.b32.xlu1 %v4981_v21, %s4702_s8 }
 0x2d7   : > { %1453 = vrot.lane.b32.xlu0 %v4994_v24, %s4702_s8 }
 0x2f9   : > { %994 = vadd.xlane.f32.xlu1 %v993_v1 }
 0x30a   : > { %1531 = vrot.lane.b32.xlu1 %v4988_v23, %s4702_s8 }
 0x33d   : > { %v986_v2 = vpop.xlane.xlu0 %985 }
 0x33e   : > { %4400 = vrcp.f32 %v986_v2 }
 0x341   : > { %v989_v3 = vpop.xlane.xlu1 %988 }
 0x342   : > { %v992_v4 = vpop.xlane.xlu0 %991  ;;  %4402 = vrcp.f32 %v989_v3 }
 0x343   : > { %4404 = vrcp.f32 %v992_v4 }
 0x345   : > { %v1378_v10 = vpop.permute.xlu1 %1377 }
 0x346   : > { %v1300_v7 = vpop.permute.xlu0 %1299 }
 0x349   : > { %v1298_v14 = vpop.permute.xlu1 %1297 }
 0x34a   : > { %v1456_v13 = vpop.permute.xlu0 %1455 }
 0x34b   : > { %v4401_v5 = vpop.eup %4400 }
 0x34c   : > { %v1000_v6 = vmul.f32 %v4401_v5, %v4393_v55 }
 0x34d   : > { %v1376_v30 = vpop.permute.xlu1 %1375 }
 0x34e   : > { %4109 = vmatmul.mubr.msk.f32.vlgmr.msra.gmra.mxu0 %vm655_vm2, %v1000_v6  ;;  %v1454_v15 = vpop.permute.xlu0 %1453 }
 0x34f   : > { %v4403_v8 = vpop.eup %4402  ;;  %4117 = vmatpush3.msra.mxu0 %v5025_v28  ;;  %4118 = vmatprep.mubr.msk.f32.mxu0 %vm4701_vm1, %v4700_v16 }
 0x350   : > { %v4405_v9 = vpop.eup %4404  ;;  %4126 = vmatprep.subr.mxu0 %v4700_v16  ;;  %v1001_v11 = vmul.f32 %v4403_v8, %v4395_v57 }
 0x351   : > { %v1002_v12 = vmul.f32 %v4405_v9, %v4397_v58  ;;  %v1534_v31 = vpop.permute.xlu1 %1533 }
 0x352   : > { %4114 = vmatmul.mubr.msk.f32.vlgmr.msra.gmra.mxu1 %vm655_vm2, %v1001_v11 }
 0x353   : > { %4119 = vmatmul.mubr.msk.f32.vlgmr.msra.gmra.mxu0 %vm655_vm2, %v1002_v12  ;;  %4122 = vmatpush3.msra.mxu1 %v5023_v27 }
 0x354   : > { %4127 = vmatpush3.xpose.msk.msra.mxu0 %vm655_vm2, %v1300_v7  ;;  %4128 = vmatprep.mubr.msk.f32.mxu0 %vm4701_vm1, %v4700_v16 }
 0x355   : > { %4136 = vmatprep.subr.mxu0 %v4700_v16  ;;  %4123 = vmatprep.mubr.msk.f32.mxu1 %vm4701_vm1, %v4700_v16 }
 0x356   : > { %4131 = vmatprep.subr.mxu1 %v4700_v16 }
 0x357   : > { %4129 = vmatmul.mubr.msk.f32.vlgmr.msra.gmra.mxu0 %vm655_vm2, %v1298_v14 }
 0x358   : > { %4137 = vmatpush3.xpose.msk.msra.mxu0 %vm655_vm2, %v1456_v13  ;;  %4138 = vmatprep.mubr.msk.f32.mxu0 %vm4701_vm1, %v4700_v16 }
 0x359   : > { %4146 = vmatprep.subr.mxu0 %v4700_v16 }
 0x35b   : > { %4139 = vmatmul.mubr.msk.f32.vlgmr.msra.gmra.mxu0 %vm655_vm2, %v1454_v15 }
 0x35c   : > { %4148 = vmatprep.mubr.msk.f32.mxu0 %vm4701_vm1, %v4700_v16 }
 0x382   : > { %v995_v32 = vpop.xlane.xlu1 %994 }
 0x383   : > { %4406 = vrcp.f32 %v995_v32 }
 0x386   : > { %v1532_v35 = vpop.permute.xlu1 %1531 }
 0x390   : > { %v4407_v33 = vpop.eup %4406 }
 0x391   : > { %v1003_v34 = vmul.f32 %v4407_v33, %v4399_v0 }
 0x393   : > { %4124 = vmatmul.mubr.msk.f32.vlgmr.msra.gmra.mxu1 %vm655_vm2, %v1003_v34 }
 0x394   : > { %4132 = vmatpush3.xpose.msk.msra.mxu1 %vm655_vm2, %v1378_v10  ;;  %4133 = vmatprep.mubr.msk.f32.mxu1 %vm4701_vm1, %v4700_v16 }
 0x395   : > { %4141 = vmatprep.subr.mxu1 %v4700_v16 }
 0x397   : > { %4134 = vmatmul.mubr.msk.f32.vlgmr.msra.gmra.mxu1 %vm655_vm2, %v1376_v30 }
 0x398   : > { %4142 = vmatpush3.xpose.msk.msra.mxu1 %vm655_vm2, %v1534_v31  ;;  %4143 = vmatprep.mubr.msk.f32.mxu1 %vm4701_vm1, %v4700_v16 }
 0x399   : > { %4151 = vmatprep.subr.mxu1 %v4700_v16 }
 0x39b   : > { %4144 = vmatmul.mubr.msk.f32.vlgmr.msra.gmra.mxu1 %vm655_vm2, %v1532_v35 }
 0x39c   : > { %4153 = vmatprep.mubr.msk.f32.mxu1 %vm4701_vm1, %v4700_v16 }
 0x40e   : > { %v5093_v36 = vpop.f32.mrf.mxu0 }
 0x410   : > { %v4110_v37 = vpop.f32.mrf.mxu0 }
 0x412   : > { %v5095_v38 = vpop.f32.mrf.mxu1 }
 0x413   : > { %v5097_v39 = vpop.f32.mrf.mxu0 }
 0x414   : > { %v4115_v40 = vpop.f32.mrf.mxu1 }
 0x415   : > { %v4120_v41 = vpop.f32.mrf.mxu0 }
 0x417   : > { %v1371_v42 = vpop.f32.mrf.mxu0 }
 0x418   : > { %v1372_v43 = vadd.f32 %v1371_v42, %v5027_v29 }
 0x419   : > { %v4130_v44 = vpop.f32.mrf.mxu0 }
 0x41a   : > { %v1609_v45 = vsel %vm655_vm2, %v1372_v43, -inf }
 0x41b   : > { %1610 = vmax.xlane.f32.xlu0 %v1609_v45  ;;  %v1527_v46 = vpop.f32.mrf.mxu0 }
 0x41c   : > { %v1528_v47 = vadd.f32 %v1527_v46, %v5027_v29  ;;  %v1296_v46 = vld [vmem:[#allocation11] sm:$0xff] }
 0x41d   : > { %v4140_v48 = vpop.f32.mrf.mxu0 }
 0x41e   : > { %v1615_v49 = vsel %vm655_vm2, %v1528_v47, -inf }
 0x41f   : > { %1616 = vmax.xlane.f32.xlu0 %v1615_v49 }
 0x453   : > { %v5103_v50 = vpop.f32.mrf.mxu1 }
 0x455   : > { %v4125_v51 = vpop.f32.mrf.mxu1 }
 0x457   : > { %v1449_v52 = vpop.f32.mrf.mxu1 }
 0x458   : > { %v1450_v53 = vadd.f32 %v1449_v52, %v5027_v29  ;;  %v1962_v52 = vld [vmem:[#allocation11 + $0x8] sm:$0xff] }
 0x459   : > { %v4135_v54 = vpop.f32.mrf.mxu1 }
 0x45a   : > { %v1612_v55 = vsel %vm655_vm2, %v1450_v53, -inf }
 0x45b   : > { %1613 = vmax.xlane.f32.xlu1 %v1612_v55  ;;  %v1605_v56 = vpop.f32.mrf.mxu1 }
 0x45c   : > { %v1606_v57 = vadd.f32 %v1605_v56, %v5027_v29 }
 0x45d   : > { %v4145_v58 = vpop.f32.mrf.mxu1 }
 0x45e   : > { %v1618_v59 = vsel %vm655_vm2, %v1606_v57, -inf }
 0x45f   : > { %1619 = vmax.xlane.f32.xlu0 %v1618_v59 }
 0x4a4   : > { %v1611_v60 = vpop.xlane.xlu0 %1610 }
 0x4a5   : > { %v1621_v61 = vsub.f32 %v1372_v43, %v1611_v60 }
 0x4a7   : > { %v1625_v62 = vmul.f32 1.442695, %v1621_v61 }
 0x4a8   : > { %v1617_v63 = vpop.xlane.xlu0 %1616 }
 0x4a9   : > { %4408 = vpow2.f32 %v1625_v62  ;;  %v1623_v0 = vsub.f32 %v1528_v47, %v1617_v63 }
 0x4ab   : > { %v1629_v1 = vmul.f32 1.442695, %v1623_v0 }
 0x4ad   : > { %4410 = vpow2.f32 %v1629_v1 }
 0x4b6   : > { %v4409_v2 = vpop.eup %4408 }
 0x4b7   : > { %v1633_v3 = vsel %vm655_vm2, %v4409_v2, 0.0 }
 0x4b8   : > { %1634 = vadd.xlane.f32.xlu0 %v1633_v3 }
 0x4ba   : > { %v4411_v4 = vpop.eup %4410 }
 0x4bb   : > { %v1639_v5 = vsel %vm655_vm2, %v4411_v4, 0.0 }
 0x4bc   : > { %1640 = vadd.xlane.f32.xlu0 %v1639_v5 }
 0x4d2   : > { %1654 = vrot.lane.b32.xlu0 %v5019_v26, %s4702_s8 }
 0x4d6   : > { %2159 = vrot.lane.b32.xlu0 %v4975_v19, %s4703_s9 }
 0x4da   : > { %2157 = vrot.lane.b32.xlu0 %v4979_v20, %s4703_s9 }
 0x4de   : > { %2315 = vrot.lane.b32.xlu0 %v4984_v22, %s4703_s9 }
 0x4e2   : > { %2313 = vrot.lane.b32.xlu0 %v4994_v24, %s4703_s9 }
 0x4e4   : > { %v1614_v6 = vpop.xlane.xlu1 %1613 }
 0x4e5   : > { %v1622_v7 = vsub.f32 %v1450_v53, %v1614_v6 }
 0x4e7   : > { %v1627_v8 = vmul.f32 1.442695, %v1622_v7 }
 0x4e8   : > { %v1620_v11 = vpop.xlane.xlu0 %1619 }
 0x4e9   : > { %4412 = vpow2.f32 %v1627_v8  ;;  %v1624_v12 = vsub.f32 %v1606_v57, %v1620_v11 }
 0x4eb   : > { %v1631_v13 = vmul.f32 1.442695, %v1624_v12 }
 0x4ed   : > { %4414 = vpow2.f32 %v1631_v13 }
 0x4f6   : > { %v4413_v9 = vpop.eup %4412 }
 0x4f7   : > { %v1636_v10 = vsel %vm655_vm2, %v4413_v9, 0.0 }
 0x4f8   : > { %1637 = vadd.xlane.f32.xlu1 %v1636_v10 }
 0x4fa   : > { %v4415_v14 = vpop.eup %4414 }
 0x4fb   : > { %v1642_v15 = vsel %vm655_vm2, %v4415_v14, 0.0 }
 0x509   : > { %1731 = vrot.lane.b32.xlu1 %v5013_v25, %s4702_s8 }
 0x50d   : > { %1808 = vrot.lane.b32.xlu1 %v5025_v28, %s4702_s8 }
 0x531   : > { %1643 = vadd.xlane.f32.xlu1 %v1642_v15 }
 0x541   : > { %v1635_v30 = vpop.xlane.xlu0 %1634 }
 0x542   : > { %4416 = vrcp.f32 %v1635_v30  ;;  %1885 = vrot.lane.b32.xlu1 %v5023_v27, %s4702_s8  ;;  %s4620_s8 = scalar_lea.vmem %s4619_s11, 1024 }
 0x543   : > { %p4622_p9 = scmp.lt.s32.totalorder %s4620_s8, %s4614_s1 }
 0x545   : > { %v1641_v31 = vpop.xlane.xlu0 %1640  ;;  %p4623_p1 = por %p4622_p9, %p4621_p5 }
 0x546   : > { %2237 = vrot.lane.b32.xlu1 %v4971_v17, %s4703_s9  ;;  %4418 = vrcp.f32 %v1641_v31 }
 0x547   : > { %p4624_p3 = pnand %p4623_p1, %p4617_p13 }
 0x549   : > { %v1655_v32 = vpop.permute.xlu0 %1654 }
 0x54a   : > { %4147 = vmatpush3.msra.mxu0 %v1655_v32  ;;  %2235 = vrot.lane.b32.xlu1 %v4973_v18, %s4703_s9 }
 0x54b   : > { %4156 = vmatprep.subr.mxu0 %v4700_v16 }
 0x54d   : > { %v2160_v57 = vpop.permute.xlu0 %2159 }
 0x54e   : > { %2393 = vrot.lane.b32.xlu1 %v4981_v21, %s4703_s9 }
 0x54f   : > { %v4417_v33 = vpop.eup %4416 }
 0x550   : > { %v1649_v34 = vmul.f32 %v4417_v33, %v4409_v2 }
 0x551   : > { %v2158_v59 = vpop.permute.xlu0 %2157 }
 0x552   : > { %4149 = vmatmul.mubr.msk.f32.vlgmr.msra.gmra.mxu0 %vm655_vm2, %v1649_v34  ;;  %2391 = vrot.lane.b32.xlu1 %v4988_v23, %s4703_s9 }
 0x553   : > { %4158 = vmatprep.mubr.msk.f32.mxu0 %vm4701_vm1, %v4700_v16  ;;  %v4419_v40 = vpop.eup %4418 }
 0x554   : > { %v1651_v42 = vmul.f32 %v4419_v40, %v4411_v4 }
 0x555   : > { %v2316_v61 = vpop.permute.xlu0 %2315 }
 0x559   : > { %v2314_v1 = vpop.permute.xlu0 %2313 }
 0x581   : > { %v1638_v35 = vpop.xlane.xlu1 %1637 }
 0x582   : > { %4420 = vrcp.f32 %v1638_v35 }
 0x585   : > { %v1732_v37 = vpop.permute.xlu1 %1731 }
 0x586   : > { %4152 = vmatpush3.msra.mxu1 %v1732_v37 }
 0x587   : > { %4161 = vmatprep.subr.mxu1 %v4700_v16 }
 0x589   : > { %v1809_v41 = vpop.permute.xlu1 %1808 }
 0x58a   : > { %4157 = vmatpush3.msra.mxu0 %v1809_v41 }
 0x58b   : > { %4159 = vmatmul.mubr.msk.f32.vlgmr.msra.gmra.mxu0 %vm655_vm2, %v1651_v42  ;;  %4166 = vmatprep.subr.mxu0 %v1962_v52 }
 0x58c   : > { %4167 = vmatpush3.msra.mxu0 %v1962_v52 }
 0x58d   : > { %4182 = vmatprep.subr.mxu0 %v4700_v16 }
 0x58f   : > { %v4421_v43 = vpop.eup %4420 }
 0x590   : > { %v1650_v44 = vmul.f32 %v4421_v43, %v4413_v9 }
 0x592   : > { %4154 = vmatmul.mubr.msk.f32.vlgmr.msra.gmra.mxu1 %vm655_vm2, %v1650_v44 }
 0x593   : > { %4163 = vmatprep.mubr.msk.f32.mxu1 %vm4701_vm1, %v4700_v16 }
 0x5ba   : > { %v1644_v45 = vpop.xlane.xlu1 %1643 }
 0x5bb   : > { %4422 = vrcp.f32 %v1644_v45 }
 0x5be   : > { %v1886_v47 = vpop.permute.xlu1 %1885 }
 0x5bf   : > { %4162 = vmatpush3.msra.mxu1 %v1886_v47 }
 0x5c0   : > { %4174 = vmatprep.subr.mxu1 %v1296_v46 }
 0x5c2   : > { %v2238_v49 = vpop.permute.xlu1 %2237 }
 0x5c6   : > { %v2236_v53 = vpop.permute.xlu1 %2235 }
 0x5c8   : > { %v4423_v48 = vpop.eup %4422 }
 0x5c9   : > { %v1652_v51 = vmul.f32 %v4423_v48, %v4415_v14 }
 0x5cb   : > { %4164 = vmatmul.mubr.msk.f32.vlgmr.msra.gmra.mxu1 %vm655_vm2, %v1652_v51 }
 0x5cc   : > { %4176 = vmatprep.mubr.msk.f32.mxu1 %vm655_vm2, %v5093_v36  ;;  %4175 = vmatpush3.msra.mxu1 %v1296_v46  ;;  %v2394_v36 = vpop.permute.xlu1 %2393 }
 0x5cd   : > { %4187 = vmatprep.subr.mxu1 %v4700_v16 }
 0x5cf   : > { %4177 = vmatmul.mubr.msk.f32.vlgmr.msra.gmra.mxu1 %vm655_vm2, %v5095_v38 }
 0x5d0   : > { %4188 = vmatpush3.xpose.msk.msra.mxu1 %vm655_vm2, %v2238_v49  ;;  %4179 = vmatprep.mubr.msk.f32.mxu1 %vm655_vm2, %v5097_v39  ;;  %v2392_v38 = vpop.permute.xlu1 %2391 }
 0x5d1   : > { %4197 = vmatprep.subr.mxu1 %v4700_v16 }
 0x5d3   : > { %4180 = vmatmul.mubr.msk.f32.gmra.mxu1 %vm655_vm2, %v5103_v50 }
 0x5d4   : > { %4189 = vmatprep.mubr.msk.f32.mxu1 %vm4701_vm1, %v4700_v16 }
 0x5d7   : > { %4190 = vmatmul.mubr.msk.f32.vlgmr.msra.gmra.mxu1 %vm655_vm2, %v2236_v53 }
 0x5d8   : > { %4198 = vmatpush3.xpose.msk.msra.mxu1 %vm655_vm2, %v2394_v36  ;;  %4199 = vmatprep.mubr.msk.f32.mxu1 %vm4701_vm1, %v4700_v16 }
 0x5d9   : > { %4207 = vmatprep.subr.mxu1 %v4700_v16 }
 0x5db   : > { %4200 = vmatmul.mubr.msk.f32.vlgmr.msra.gmra.mxu1 %vm655_vm2, %v2392_v38 }
 0x5dc   : > { %4209 = vmatprep.mubr.msk.f32.mxu1 %vm4701_vm1, %v4700_v16 }
 0x612   : > { %v1726_v39 = vpop.f32.mrf.mxu0 }
 0x613   : > { %4168 = vmatprep.mubr.msk.f32.mxu0 %vm655_vm2, %v1726_v39 }
 0x614   : > { %v4150_v50 = vpop.f32.mrf.mxu0 }
 0x64b   : > { %v1880_v54 = vpop.f32.mrf.mxu0 }
 0x64d   : > { %v4160_v55 = vpop.f32.mrf.mxu0 }
 0x652   : > { %v1803_v56 = vpop.f32.mrf.mxu1 }
 0x653   : > { %4169 = vmatmul.mubr.msk.f32.vlgmr.msra.gmra.mxu0 %vm655_vm2, %v1803_v56 }
 0x654   : > { %4183 = vmatpush3.xpose.msk.msra.mxu0 %vm655_vm2, %v2160_v57  ;;  %v4155_v58 = vpop.f32.mrf.mxu1  ;;  %4171 = vmatprep.mubr.msk.f32.mxu0 %vm655_vm2, %v1880_v54 }
 0x655   : > { %4192 = vmatprep.subr.mxu0 %v4700_v16 }
 0x68b   : > { %v1957_v60 = vpop.f32.mrf.mxu1 }
 0x68c   : > { %4172 = vmatmul.mubr.msk.f32.gmra.mxu0 %vm655_vm2, %v1957_v60 }
 0x68d   : > { %v4165_v62 = vpop.f32.mrf.mxu1  ;;  %4184 = vmatprep.mubr.msk.f32.mxu0 %vm4701_vm1, %v4700_v16 }
 0x68f   : > { %v5177_v63 = vpop.f32.mrf.mxu1 }
 0x690   : > { %4185 = vmatmul.mubr.msk.f32.vlgmr.msra.gmra.mxu0 %vm655_vm2, %v2158_v59 }
 0x691   : > { %4193 = vmatpush3.xpose.msk.msra.mxu0 %vm655_vm2, %v2316_v61  ;;  %v5181_v0 = vpop.f32.mrf.mxu1  ;;  %4194 = vmatprep.mubr.msk.f32.mxu0 %vm4701_vm1, %v4700_v16 }
 0x692   : > { %4202 = vmatprep.subr.mxu0 %v4700_v16 }
 0x693   : > { %v5186_v2 = vpop.f32.mrf.mxu1 }
 0x694   : > { %4195 = vmatmul.mubr.msk.f32.vlgmr.msra.gmra.mxu0 %vm655_vm2, %v2314_v1 }
 0x695   : > { %v5189_v3 = vpop.f32.mrf.mxu1  ;;  %4204 = vmatprep.mubr.msk.f32.mxu0 %vm4701_vm1, %v4700_v16 }
 0x697   : > { %v2309_v4 = vpop.f32.mrf.mxu1 }
 0x698   : > { %v2310_v5 = vadd.f32 %v2309_v4, %v5027_v29 }
 0x699   : > { %v4191_v6 = vpop.f32.mrf.mxu1 }
 0x69a   : > { %v2472_v7 = vsel %vm655_vm2, %v2310_v5, -inf }
 0x69b   : > { %2473 = vmax.xlane.f32.xlu1 %v2472_v7  ;;  %v2465_v8 = vpop.f32.mrf.mxu1 }
 0x69c   : > { %v2466_v43 = vadd.f32 %v2465_v8, %v5027_v29 }
 0x69d   : > { %v4201_v9 = vpop.f32.mrf.mxu1 }
 0x69e   : > { %v2478_v45 = vsel %vm655_vm2, %v2466_v43, -inf }
 0x713   : > { %v5199_v15 = vpop.f32.mrf.mxu0 }
 0x715   : > { %v5201_v30 = vpop.f32.mrf.mxu0 }
 0x724   : > { %v2474_v10 = vpop.xlane.xlu1 %2473 }
 0x725   : > { %v2482_v11 = vsub.f32 %v2310_v5, %v2474_v10 }
 0x727   : > { %v2487_v12 = vmul.f32 1.442695, %v2482_v11 }
 0x729   : > { %4424 = vpow2.f32 %v2487_v12  ;;  %v2818_v12 = vld [vmem:[#allocation11 + $0x10] sm:$0xff] }
 0x736   : > { %v5195_v13 = vpop.eup %4424 }
 0x737   : > { %v2496_v14 = vsel %vm655_vm2, %v5195_v13, 0.0 }
 0x738   : > { %2497 = vadd.xlane.f32.xlu1 %v2496_v14 }
 0x74c   : > { %v5203_v31 = vpop.f32.mrf.mxu0 }
 0x74e   : > { %v5205_v32 = vpop.f32.mrf.mxu0 }
 0x750   : > { %v2231_v33 = vpop.f32.mrf.mxu0 }
 0x751   : > { %v2232_v34 = vadd.f32 %v2231_v33, %v5027_v29 }
 0x752   : > { %v4186_v35 = vpop.f32.mrf.mxu0 }
 0x753   : > { %v2469_v37 = vsel %vm655_vm2, %v2232_v34, -inf }
 0x754   : > { %2470 = vmax.xlane.f32.xlu0 %v2469_v37  ;;  %v2387_v40 = vpop.f32.mrf.mxu0 }
 0x755   : > { %v2388_v41 = vadd.f32 %v2387_v40, %v5027_v29 }
 0x756   : > { %v4196_v42 = vpop.f32.mrf.mxu0 }
 0x757   : > { %v2475_v44 = vsel %vm655_vm2, %v2388_v41, -inf }
 0x758   : > { %2476 = vmax.xlane.f32.xlu0 %v2475_v44 }
 0x75c   : > { %2479 = vmax.xlane.f32.xlu0 %v2478_v45 }
 0x7dd   : > { %v2471_v46 = vpop.xlane.xlu0 %2470 }
 0x7de   : > { %v2481_v47 = vsub.f32 %v2232_v34, %v2471_v46 }
 0x7e0   : > { %v2485_v48 = vmul.f32 1.442695, %v2481_v47 }
 0x7e1   : > { %v2477_v49 = vpop.xlane.xlu0 %2476 }
 0x7e2   : > { %4426 = vpow2.f32 %v2485_v48  ;;  %v2483_v51 = vsub.f32 %v2388_v41, %v2477_v49 }
 0x7e4   : > { %v2489_v52 = vmul.f32 1.442695, %v2483_v51 }
 0x7e5   : > { %v2480_v53 = vpop.xlane.xlu0 %2479 }
 0x7e6   : > { %4428 = vpow2.f32 %v2489_v52  ;;  %v2484_v36 = vsub.f32 %v2466_v43, %v2480_v53 }
 0x7e8   : > { %v2491_v38 = vmul.f32 1.442695, %v2484_v36 }
 0x7ea   : > { %4430 = vpow2.f32 %v2491_v38 }
 0x7ef   : > { %v4427_v39 = vpop.eup %4426 }
 0x7f0   : > { %v2493_v50 = vsel %vm655_vm2, %v4427_v39, 0.0 }
 0x7f1   : > { %2494 = vadd.xlane.f32.xlu0 %v2493_v50 }
 0x7f3   : > { %v4429_v54 = vpop.eup %4428 }
 0x7f4   : > { %v2499_v55 = vsel %vm655_vm2, %v4429_v54, 0.0 }
 0x7f5   : > { %2500 = vadd.xlane.f32.xlu0 %v2499_v55 }
 0x7f7   : > { %v4431_v56 = vpop.eup %4430 }
 0x7f8   : > { %v2502_v57 = vsel %vm655_vm2, %v4431_v56, 0.0 }
 0x7f9   : > { %2503 = vadd.xlane.f32.xlu1 %v2502_v57 }
 0x80a   : > { %2589 = vrot.lane.b32.xlu1 %v5013_v25, %s4703_s9 }
 0x80b   : > { %2513 = vrot.lane.b32.xlu0 %v5019_v26, %s4703_s9 }
 0x80e   : > { %2665 = vrot.lane.b32.xlu1 %v5025_v28, %s4703_s9 }
 0x80f   : > { %2922 = vrot.lane.b32.xlu0 %v4975_v19, %s4704_s21  ;;  %v2498_v19 = vpop.xlane.xlu1 %2497 }
 0x810   : > { %4432 = vrcp.f32 %v2498_v19  ;;  %v2144_v19 = vadd.f32 %v5177_v63, %v5199_v15 }
 0x812   : > { %2741 = vrot.lane.b32.xlu1 %v5023_v27, %s4703_s9 }
 0x813   : > { %3000 = vrot.lane.b32.xlu0 %v4971_v17, %s4704_s21 }
 0x816   : > { %2920 = vrot.lane.b32.xlu1 %v4979_v20, %s4704_s21 }
 0x817   : > { %3078 = vrot.lane.b32.xlu0 %v4984_v22, %s4704_s21 }
 0x81a   : > { %2998 = vrot.lane.b32.xlu1 %v4973_v18, %s4704_s21 }
 0x81b   : > { %3076 = vrot.lane.b32.xlu0 %v4994_v24, %s4704_s21 }
 0x81d   : > { %v4433_v59 = vpop.eup %4432 }
 0x81e   : > { %3156 = vrot.lane.b32.xlu1 %v4981_v21, %s4704_s21  ;;  %v2510_v24 = vmul.f32 %v4433_v59, %v5195_v13 }
 0x822   : > { %3154 = vrot.lane.b32.xlu1 %v4988_v23, %s4704_s21 }
 0x87a   : > { %v2495_v17 = vpop.xlane.xlu0 %2494 }
 0x87b   : > { %4434 = vrcp.f32 %v2495_v17 }
 0x87e   : > { %v2501_v20 = vpop.xlane.xlu0 %2500 }
 0x87f   : > { %4436 = vrcp.f32 %v2501_v20  ;;  %v2139_v20 = vadd.f32 %v5181_v0, %v5201_v30 }
 0x882   : > { %v2504_v58 = vpop.xlane.xlu1 %2503  ;;  %v2514_v22 = vpop.permute.xlu0 %2513 }
 0x883   : > { %4438 = vrcp.f32 %v2504_v58  ;;  %4203 = vmatpush3.msra.mxu0 %v2514_v22 }
 0x884   : > { %4212 = vmatprep.subr.mxu0 %v4700_v16 }
 0x886   : > { %v2590_v18 = vpop.permute.xlu1 %2589  ;;  %v2923_v5 = vpop.permute.xlu0 %2922 }
 0x887   : > { %4208 = vmatpush3.msra.mxu1 %v2590_v18 }
 0x888   : > { %v4435_v21 = vpop.eup %4434  ;;  %4210 = vmatmul.mubr.msk.f32.vlgmr.msra.gmra.mxu1 %vm655_vm2, %v2510_v24  ;;  %4217 = vmatprep.subr.mxu1 %v4700_v16  ;;  %v2154_v24 = vadd.f32 %v5186_v2, %v5203_v31 }
 0x889   : > { %v2509_v23 = vmul.f32 %v4435_v21, %v4427_v39  ;;  %4219 = vmatprep.mubr.msk.f32.mxu1 %vm4701_vm1, %v4700_v16 }
 0x88a   : > { %v2666_v60 = vpop.permute.xlu1 %2665  ;;  %v3001_v9 = vpop.permute.xlu0 %3000 }
 0x88b   : > { %4205 = vmatmul.mubr.msk.f32.vlgmr.msra.gmra.mxu0 %vm655_vm2, %v2509_v23  ;;  %v2149_v23 = vadd.f32 %v5189_v3, %v5205_v32 }
 0x88c   : > { %v4437_v61 = vpop.eup %4436  ;;  %4213 = vmatpush3.msra.mxu0 %v2666_v60  ;;  %4214 = vmatprep.mubr.msk.f32.mxu0 %vm4701_vm1, %v4700_v16 }
 0x88d   : > { %v2511_v62 = vmul.f32 %v4437_v61, %v4429_v54  ;;  %4222 = vmatprep.subr.mxu0 %v2818_v12 }
 0x88e   : > { %v2742_v1 = vpop.permute.xlu1 %2741  ;;  %v3079_v34 = vpop.permute.xlu0 %3078 }
 0x88f   : > { %4215 = vmatmul.mubr.msk.f32.vlgmr.msra.gmra.mxu0 %vm655_vm2, %v2511_v62  ;;  %4218 = vmatpush3.msra.mxu1 %v2742_v1 }
 0x890   : > { %v4439_v4 = vpop.eup %4438  ;;  %4230 = vmatprep.subr.mxu1 %v4700_v16  ;;  %4223 = vmatpush3.msra.mxu0 %v2818_v12 }
 0x891   : > { %v2512_v6 = vmul.f32 %v4439_v4, %v4431_v56  ;;  %4240 = vmatprep.subr.mxu0 %v4700_v16 }
 0x892   : > { %v2921_v7 = vpop.permute.xlu1 %2920  ;;  %v3077_v43 = vpop.permute.xlu0 %3076 }
 0x893   : > { %4220 = vmatmul.mubr.msk.f32.vlgmr.msra.gmra.mxu1 %vm655_vm2, %v2512_v6 }
 0x894   : > { %4231 = vmatpush3.xpose.msk.msra.mxu1 %vm655_vm2, %v2923_v5  ;;  %4232 = vmatprep.mubr.msk.f32.mxu1 %vm4701_vm1, %v4700_v16 }
 0x895   : > { %4235 = vmatprep.subr.mxu1 %v4700_v16 }
 0x896   : > { %v2999_v8 = vpop.permute.xlu1 %2998 }
 0x897   : > { %4233 = vmatmul.mubr.msk.f32.vlgmr.msra.gmra.mxu1 %vm655_vm2, %v2921_v7 }
 0x898   : > { %4236 = vmatpush3.xpose.msk.msra.mxu1 %vm655_vm2, %v3001_v9  ;;  %4237 = vmatprep.mubr.msk.f32.mxu1 %vm4701_vm1, %v4700_v16 }
 0x899   : > { %4245 = vmatprep.subr.mxu1 %v4700_v16 }
 0x89a   : > { %v3157_v10 = vpop.permute.xlu1 %3156 }
 0x89b   : > { %4238 = vmatmul.mubr.msk.f32.vlgmr.msra.gmra.mxu1 %vm655_vm2, %v2999_v8 }
 0x89c   : > { %4246 = vmatpush3.xpose.msk.msra.mxu1 %vm655_vm2, %v3157_v10  ;;  %4247 = vmatprep.mubr.msk.f32.mxu1 %vm4701_vm1, %v4700_v16 }
 0x89d   : > { %4255 = vmatprep.subr.mxu1 %v4700_v16 }
 0x89e   : > { %v3155_v11 = vpop.permute.xlu1 %3154 }
 0x89f   : > { %4248 = vmatmul.mubr.msk.f32.vlgmr.msra.gmra.mxu1 %vm655_vm2, %v3155_v11 }
 0x8a0   : > { %4257 = vmatprep.mubr.msk.f32.mxu1 %vm4701_vm1, %v4700_v16 }
 0x948   : > { %v2661_v13 = vpop.f32.mrf.mxu1 }
 0x94a   : > { %v4211_v14 = vpop.f32.mrf.mxu1 }
 0x94b   : > { %v2585_v33 = vpop.f32.mrf.mxu0 }
 0x94c   : > { %4224 = vmatprep.mubr.msk.f32.mxu0 %vm655_vm2, %v2585_v33 }
 0x94d   : > { %v4206_v35 = vpop.f32.mrf.mxu0  ;;  %4225 = vmatmul.mubr.msk.f32.vlgmr.msra.gmra.mxu0 %vm655_vm2, %v2661_v13 }
 0x94e   : > { %4241 = vmatpush3.xpose.msk.msra.mxu0 %vm655_vm2, %v3079_v34 }
 0x94f   : > { %v2737_v37 = vpop.f32.mrf.mxu0  ;;  %4250 = vmatprep.subr.mxu0 %v4700_v16 }
 0x950   : > { %4227 = vmatprep.mubr.msk.f32.mxu0 %vm655_vm2, %v2737_v37 }
 0x951   : > { %v4216_v40 = vpop.f32.mrf.mxu0 }
 0x953   : > { %v2813_v41 = vpop.f32.mrf.mxu1 }
 0x954   : > { %4228 = vmatmul.mubr.msk.f32.gmra.mxu0 %vm655_vm2, %v2813_v41 }
 0x955   : > { %v4221_v42 = vpop.f32.mrf.mxu1  ;;  %4242 = vmatprep.mubr.msk.f32.mxu0 %vm4701_vm1, %v4700_v16 }
 0x957   : > { %v2994_v44 = vpop.f32.mrf.mxu1 }
 0x958   : > { %v2995_v45 = vadd.f32 %v2994_v44, %v5027_v29  ;;  %4243 = vmatmul.mubr.msk.f32.vlgmr.msra.gmra.mxu0 %vm655_vm2, %v3077_v43 }
 0x959   : > { %v4234_v46 = vpop.f32.mrf.mxu1  ;;  %4252 = vmatprep.mubr.msk.f32.mxu0 %vm4701_vm1, %v4700_v16 }
 0x95a   : > { %v3232_v47 = vsel %vm655_vm2, %v2995_v45, -inf }
 0x95b   : > { %3233 = vmax.xlane.f32.xlu0 %v3232_v47  ;;  %v3072_v48 = vpop.f32.mrf.mxu1 }
 0x95c   : > { %v3073_v49 = vadd.f32 %v3072_v48, %v5027_v29 }
 0x95d   : > { %v4239_v51 = vpop.f32.mrf.mxu1 }
 0x95e   : > { %v3235_v52 = vsel %vm655_vm2, %v3073_v49, -inf }
 0x95f   : > { %3236 = vmax.xlane.f32.xlu1 %v3235_v52  ;;  %v3228_v53 = vpop.f32.mrf.mxu1 }
 0x960   : > { %v3229_v62 = vadd.f32 %v3228_v53, %v5027_v29 }
 0x961   : > { %v4249_v36 = vpop.f32.mrf.mxu1 }
 0x962   : > { %v3241_v2 = vsel %vm655_vm2, %v3229_v62, -inf }
 0x9e4   : > { %v3234_v56 = vpop.xlane.xlu0 %3233 }
 0x9e5   : > { %v3244_v57 = vsub.f32 %v2995_v45, %v3234_v56  ;;  %v3581_v45 = vld [vmem:[#allocation11 + $0x18] sm:$0xff] }
 0x9e7   : > { %v3248_v22 = vmul.f32 1.442695, %v3244_v57 }
 0x9e8   : > { %v3237_v38 = vpop.xlane.xlu1 %3236 }
 0x9e9   : > { %v3245_v39 = vsub.f32 %v3073_v49, %v3237_v38  ;;  %v3928_v38 = vld [vmem:[%s5403_s6] ss:$0 sm:$0xff] }
 0x9eb   : > { %v3250_v50 = vmul.f32 1.442695, %v3245_v39 }
 0x9ed   : > { %4440 = vpow2.f32 %v3250_v50 }
 0x9ee   : > { %4442 = vpow2.f32 %v3248_v22 }
 0x9fa   : > { %v5285_v54 = vpop.eup %4440 }
 0x9fb   : > { %v3259_v55 = vsel %vm655_vm2, %v5285_v54, 0.0  ;;  %v4443_v31 = vpop.eup %4442 }
 0x9fc   : > { %3260 = vadd.xlane.f32.xlu1 %v3259_v55  ;;  %v3256_v3 = vsel %vm655_vm2, %v4443_v31, 0.0 }
 0xa0d   : > { %v4226_v17 = vpop.f32.mrf.mxu0 }
 0xa0e   : > { %v5293_v58 = vadd.f32 %v4226_v17, %v2144_v19 }
 0xa0f   : > { %v2897_v59 = vpop.f32.mrf.mxu0 }
 0xa10   : > { %v5295_v18 = vadd.f32 %v2897_v59, %v2139_v20 }
 0xa14   : > { %v4229_v21 = vpop.f32.mrf.mxu0 }
 0xa15   : > { %v5301_v60 = vadd.f32 %v4229_v21, %v2154_v24 }
 0xa16   : > { %v2907_v63 = vpop.f32.mrf.mxu0 }
 0xa17   : > { %v5303_v15 = vadd.f32 %v2907_v63, %v2149_v23 }
 0xa18   : > { %v3150_v0 = vpop.f32.mrf.mxu0 }
 0xa19   : > { %v3151_v30 = vadd.f32 %v3150_v0, %v5027_v29 }
 0xa1a   : > { %v4244_v61 = vpop.f32.mrf.mxu0 }
 0xa1b   : > { %v3238_v1 = vsel %vm655_vm2, %v3151_v30, -inf }
 0xa1c   : > { %3239 = vmax.xlane.f32.xlu0 %v3238_v1 }
 0xa20   : > { %3242 = vmax.xlane.f32.xlu0 %v3241_v2 }
 0xa24   : > { %3257 = vadd.xlane.f32.xlu0 %v3256_v3 }
 0xa85   : > { %v3261_v13 = vpop.xlane.xlu1 %3260 }
 0xaa5   : > { %v3240_v32 = vpop.xlane.xlu0 %3239 }
 0xaa6   : > { %v3246_v4 = vsub.f32 %v3151_v30, %v3240_v32 }
 0xaa8   : > { %v3252_v5 = vmul.f32 1.442695, %v3246_v4 }
 0xaa9   : > { %v3243_v6 = vpop.xlane.xlu0 %3242 }
 0xaaa   : > { %4444 = vpow2.f32 %v3252_v5  ;;  %v3247_v7 = vsub.f32 %v3229_v62, %v3243_v6 }
 0xaac   : > { %v3254_v8 = vmul.f32 1.442695, %v3247_v7 }
 0xaad   : > { %v3258_v12 = vpop.xlane.xlu0 %3257 }
 0xaae   : > { %4446 = vpow2.f32 %v3254_v8 }
 0xaaf   : > { %4448 = vrcp.f32 %v3258_v12 }
 0xab0   : > { %4450 = vrcp.f32 %v3261_v13 }
 0xab7   : > { %v4445_v9 = vpop.eup %4444 }
 0xab8   : > { %v3262_v29 = vsel %vm655_vm2, %v4445_v9, 0.0 }
 0xab9   : > { %3263 = vadd.xlane.f32.xlu0 %v3262_v29 }
 0xabb   : > { %v4447_v10 = vpop.eup %4446 }
 0xabc   : > { %v3265_v11 = vsel %vm655_vm2, %v4447_v10, 0.0  ;;  %v4449_v33 = vpop.eup %4448 }
 0xabd   : > { %3266 = vadd.xlane.f32.xlu1 %v3265_v11  ;;  %v3272_v37 = vmul.f32 %v4449_v33, %v4443_v31 }
 0xace   : > { %3352 = vrot.lane.b32.xlu1 %v5013_v25, %s4704_s21  ;;  %v4451_v25 = vpop.eup %4450 }
 0xacf   : > { %3276 = vrot.lane.b32.xlu0 %v5019_v26, %s4704_s21 }
 0xad2   : > { %3428 = vrot.lane.b32.xlu1 %v5025_v28, %s4704_s21 }
 0xad6   : > { %3504 = vrot.lane.b32.xlu1 %v5023_v27, %s4704_s21  ;;  %v3273_v27 = vmul.f32 %v4451_v25, %v5285_v54 }
 0xb42   : > { %v3264_v14 = vpop.xlane.xlu0 %3263 }
 0xb43   : > { %4452 = vrcp.f32 %v3264_v14 }
 0xb46   : > { %v3267_v34 = vpop.xlane.xlu1 %3266  ;;  %v3277_v35 = vpop.permute.xlu0 %3276 }
 0xb47   : > { %4454 = vrcp.f32 %v3267_v34  ;;  %4251 = vmatpush3.msra.mxu0 %v3277_v35 }
 0xb48   : > { %4253 = vmatmul.mubr.msk.f32.vlgmr.msra.gmra.mxu0 %vm655_vm2, %v3272_v37  ;;  %4260 = vmatprep.subr.mxu0 %v4700_v16 }
 0xb49   : > { %4262 = vmatprep.mubr.msk.f32.mxu0 %vm4701_vm1, %v4700_v16 }
 0xb4a   : > { %v3353_v26 = vpop.permute.xlu1 %3352 }
 0xb4b   : > { %4256 = vmatpush3.msra.mxu1 %v3353_v26 }
 0xb4c   : > { %4258 = vmatmul.mubr.msk.f32.vlgmr.msra.gmra.mxu1 %vm655_vm2, %v3273_v27  ;;  %4265 = vmatprep.subr.mxu1 %v4700_v16 }
 0xb4d   : > { %4267 = vmatprep.mubr.msk.f32.mxu1 %vm4701_vm1, %v4700_v16 }
 0xb4e   : > { %v3429_v28 = vpop.permute.xlu1 %3428 }
 0xb4f   : > { %4261 = vmatpush3.msra.mxu0 %v3429_v28 }
 0xb50   : > { %v4453_v40 = vpop.eup %4452  ;;  %4270 = vmatprep.subr.mxu0 %v3581_v45 }
 0xb51   : > { %v3274_v41 = vmul.f32 %v4453_v40, %v4445_v9 }
 0xb52   : > { %v3505_v42 = vpop.permute.xlu1 %3504 }
 0xb53   : > { %4263 = vmatmul.mubr.msk.f32.vlgmr.msra.gmra.mxu0 %vm655_vm2, %v3274_v41  ;;  %4266 = vmatpush3.msra.mxu1 %v3505_v42 }
 0xb54   : > { %v4455_v43 = vpop.eup %4454  ;;  %4271 = vmatpush3.msra.mxu0 %v3581_v45 }
 0xb55   : > { %v3275_v44 = vmul.f32 %v4455_v43, %v4447_v10 }
 0xb57   : > { %4268 = vmatmul.mubr.msk.f32.vlgmr.msra.gmra.mxu1 %vm655_vm2, %v3275_v44 }
 0xc08   : > { %v3348_v46 = vpop.f32.mrf.mxu0 }
 0xc09   : > { %4272 = vmatprep.mubr.msk.f32.mxu0 %vm655_vm2, %v3348_v46 }
 0xc0a   : > { %v4254_v47 = vpop.f32.mrf.mxu0 }
 0xc0c   : > { %v3424_v16 = vpop.f32.mrf.mxu1 }
 0xc0d   : > { %4273 = vmatmul.mubr.msk.f32.vlgmr.msra.gmra.mxu0 %vm655_vm2, %v3424_v16 }
 0xc0e   : > { %v4259_v48 = vpop.f32.mrf.mxu1 }
 0xc13   : > { %v3500_v49 = vpop.f32.mrf.mxu0 }
 0xc14   : > { %4275 = vmatprep.mubr.msk.f32.mxu0 %vm655_vm2, %v3500_v49 }
 0xc15   : > { %v4264_v51 = vpop.f32.mrf.mxu0 }
 0xc17   : > { %v3576_v52 = vpop.f32.mrf.mxu1 }
 0xc18   : > { %4276 = vmatmul.mubr.msk.f32.gmra.mxu0 %vm655_vm2, %v3576_v52 }
 0xc19   : > { %v4269_v53 = vpop.f32.mrf.mxu1 }
 0xccd   : > { %v4274_v36 = vpop.f32.mrf.mxu0 }
 0xcce   : > { %v3680_v39 = vadd.f32 %v4274_v36, %v5293_v58 }
 0xccf   : > { %v3660_v50 = vpop.f32.mrf.mxu0 }
 0xcd0   : > { %v3691_v54 = vadd.f32 %v3928_v38, %v3680_v39  ;;  %v3679_v55 = vadd.f32 %v3660_v50, %v5295_v18 }
 0xcd2   : > { %3695 = vst.msk [vmem:[%s367_s18 + $0x8] sm:$0xff] %vm378_vm0, %v3691_v54  ;;  %v3690_v56 = vadd.f32 %v3928_v38, %v3679_v55 }
 0xcd4   : > { %3694 = vst.msk [vmem:[%s367_s18] sm:$0xff] %vm378_vm0, %v3690_v56 }
 0xcd8   : > { %v4277_v57 = vpop.f32.mrf.mxu0 }
 0xcd9   : > { %v3682_v19 = vadd.f32 %v4277_v57, %v5301_v60 }
 0xcda   : > { %v3670_v17 = vpop.f32.mrf.mxu0 }
 0xcdb   : > { %v3693_v20 = vadd.f32 %v3928_v38, %v3682_v19  ;;  %v3681_v58 = vadd.f32 %v3670_v17, %v5303_v15 }
 0xcdd   : > { %3697 = vst.msk [vmem:[%s367_s18 + $0x18] sm:$0xff] %vm378_vm0, %v3693_v20  ;;  %v3692_v22 = vadd.f32 %v3928_v38, %v3681_v58 }
 0xcdf   : > { %3696 = vst.msk [vmem:[%s367_s18 + $0x10] sm:$0xff] %vm378_vm0, %v3692_v22 }
 0xce0   : > { %4627 = shalt.err (!%p4624_p3)
}
 0xce1   : > { %s4628_s9 = scalar_lea.hbm %s5352_s17, 512  ;;  %s4632_s28 = scalar_lea.hbm %s5404_s7, 1024 }
 0xce2   : > { %p4629_p4 = scmp.ne.s32.totalorder %s5352_s17, %s4628_s9  ;;  %p4633_p2 = scmp.lt.s32.totalorder %s5352_s17, %s5404_s7 }
 0xce3   : > { %p4634_p7 = scmp.lt.s32.totalorder %s4632_s28, %s4628_s9 }
 0xce4   : > { %p4630_p12 = pnand %p4629_p4, %p5430_p10 }
 0xce5   : > { %p4635_p8 = por %p4634_p7, %p4633_p2 }
 0xce6   : > { %p4631_p6 = pneg %p4630_p12 }
 0xce8   : > { %p4636_p11 = pnand %p4635_p8, %p4631_p6 }
 0xcea   : > { %4639 = shalt.err (!%p4636_p11)
}
 0xceb   : > { %s4706_s13 = smov 128   ;;  %s4707_s19 = smov 8  }
 0xcec   : > { %4308 = dma.vmem_to_hbm [thread:$0]  (%p5430_p10), %s5346_s22, 512, %s5352_s17, %s3699_s30, %s4706_s13, %s4706_s13, %s4707_s19  }
 0xced PF: > { %s3727_s1 = sand.u32 1, %s4678_s24   ;;  %p5431_p0 = scmp.ne.s32.totalorder %s5418_s15, 0 }
 0xcee   : > { %p5432_p13 = scmp.ge.s32.totalorder %s4690_s27, 2  ;;  %s3728_s16 = scalar_lea.sflag [#allocation4], %s3727_s1 }
 0xcf0   : > { %p4331_p5 = pnand %p5432_p13, %p5431_p0 }
 0xcf2   : > { %p4332_p9 = pneg %p4331_p5 }
 0xcf4   : > { %4673 = dma.done.wait (%p4332_p9), %s3728_s16, 512  }
 0xcf5   : > { %4675 = vsyncadd (%p4332_p9), %s3728_s16, 4294966784  ;;  %p23_p1 = scmp.ge.s32.totalorder %s4856_s14, 4   ;;  %s5433_s24 = smov %s4682_s25 }
 0xcf6   : > { %s5434_s25 = smov %s4686_s26  ;;  %s5435_s26 = smov %s4868_s29 }
 0xcf7   : > { %s5436_s27 = smov %s4856_s14  ;;  %25 = sbr.rel (!%p23_p1) target bundleno = 10 (0xa), region = 116 }
 0xcfc   :  { %3733 = vsyncpa [#allocation3], 1 }
 0xcfd   :  { %3735 = vsyncpa [#allocation3 + $0x1], 1 }
 0xcfe   :  { %3736 = vsyncpa [#allocation6], 1 }
 0xcff   :  { %3737 = vsyncpa [#allocation9], 1 }
 0xd00   :  { %3738 = vsyncpa [#allocation12], 1 }
 0xd01   :  { %3739 = vsyncpa [#allocation4], 1 }
 0xd02   :  { %3741 = vsyncpa [#allocation4 + $0x1], 1 }

</bundles_post_ra>
